<compile_context>
chip_gen: v7x
topology: tpu7x:2x2x1
jax: 0.10.0
libtpu: 0.0.40
codegen_flags: <defaults>
</compile_context>

<pallas_src>
import math

import jax
import jax.numpy as jnp
from jax.experimental import pallas as pl
from jax.experimental.pallas import tpu as pltpu

# ---------------- model hyper-parameters (small, synthetic) ----------------
B, S, D = 2, 8, 32           # batch, seq-len, embed_dim
H = 4                        # num attention heads
HD = D // H                  # head dim
FFN = 64                     # ffn hidden dim
VOCAB = 32                   # vocab size
NUM_LAYERS = 2               # cfg.encoder.num_layers
PADDING_IDX = 1              # cfg.padding_idx
EMBED_SCALE = math.sqrt(D)   # fairseq embed scale
LN_EPS = 1e-5                # torch LayerNorm default eps
ATTN_SCALE = 1.0 / math.sqrt(HD)
BS = B * S
NEG = -1e9

# lane-aligned column offsets inside the stacked weight slab (width 384)
WA_WIDTH = 384
OFF_QKV = 0        # wqkv: (D, 3*D)  at lanes [0, 96)
OFF_WO = 128       # wo  : (D, D)    at lanes [128, 160)
OFF_W1 = 256       # w1  : (D, FFN)  at lanes [256, 320)
VEC_WIDTH = 3 * D  # 96 lanes for the per-layer vector pack


# ---------------------------- shared math helper ----------------------------
def _ln(x, g, b):
    mu = jnp.mean(x, axis=-1, keepdims=True)
    var = jnp.mean((x - mu) ** 2, axis=-1, keepdims=True)
    return (x - mu) * jax.lax.rsqrt(var + LN_EPS) * g + b


# ------------------------------- fused kernel -------------------------------
def encoder_kernel(x_ref, bias_ref, wa_ref, w2_ref, vec_ref, o_ref):
    x = x_ref[...]                 # (BS, D) embedded + pad-zeroed activations
    bias = bias_ref[...]           # (BS, BS) block-diagonal + key-padding bias (hoisted)

    for l in range(NUM_LAYERS):    # static unroll; all weights resident in VMEM
        # ---- lane-aligned static slices of the packed weight slab ----
        wqkv = wa_ref[l, :, OFF_QKV:OFF_QKV + 3 * D]      # (D, 3D)
        wo = wa_ref[l, :, OFF_WO:OFF_WO + D]              # (D, D)
        w1 = wa_ref[l, :, OFF_W1:OFF_W1 + FFN]            # (D, FFN)
        w2 = w2_ref[l]                                    # (FFN, D)

        bqkv = vec_ref[l, 0:1, 0:3 * D]                   # (1, 3D)
        bo = vec_ref[l, 1:2, 0:D]
        g1 = vec_ref[l, 2:3, 0:D]
        b1 = vec_ref[l, 3:4, 0:D]
        g2 = vec_ref[l, 4:5, 0:D]
        b2 = vec_ref[l, 5:6, 0:D]
        bf1 = vec_ref[l, 6:7, 0:FFN]
        bf2 = vec_ref[l, 7:8, 0:D]

        # ---------------- self-attention block (normalize_before=True) ----
        residual = x
        h = _ln(x, g1, b1)                                             # (BS, D)
        # single lane-dense projection for Q|K|V (attn scale folded into wq/bq)
        qkv = jnp.dot(h, wqkv, preferred_element_type=jnp.float32) + bqkv   # (BS, 3D)

        ov_heads = []
        for hh in range(H):        # static unroll over heads; all matmuls 2-D
            q = qkv[:, hh * HD:(hh + 1) * HD]                          # (BS, HD)
            k = qkv[:, D + hh * HD:D + (hh + 1) * HD]                  # (BS, HD)
            v = qkv[:, 2 * D + hh * HD:2 * D + (hh + 1) * HD]          # (BS, HD)

            s = jnp.einsum('qd,kd->qk', q, k,
                           preferred_element_type=jnp.float32)          # (BS, BS)
            s = s + bias                                                # mask cross-batch + padded keys
            s = s - jnp.max(s, axis=-1, keepdims=True)
            p = jnp.exp(s)
            p = p * pl.reciprocal(jnp.sum(p, axis=-1, keepdims=True), approx=True)

            ov_heads.append(jnp.dot(p, v, preferred_element_type=jnp.float32))  # (BS, HD)

        # lane-pack heads -> (BS, D); head reduction happens inside the wo contraction
        ov = jnp.concatenate(ov_heads, axis=-1)                         # (BS, D)
        attn = jnp.dot(ov, wo, preferred_element_type=jnp.float32) + bo
        x = residual + attn

        # ---------------- feed-forward block (normalize_before=True) ------
        residual = x
        h = _ln(x, g2, b2)
        h = jnp.dot(h, w1, preferred_element_type=jnp.float32) + bf1
        h = jnp.maximum(h, 0.0)            # relu
        h = jnp.dot(h, w2, preferred_element_type=jnp.float32) + bf2
        x = residual + h

    # ---------------- final LayerNorm (normalize_before=True) -------------
    gf = vec_ref[NUM_LAYERS, 0:1, 0:D]
    bf = vec_ref[NUM_LAYERS, 1:2, 0:D]
    o_ref[...] = _ln(x, gf, bf)


# -------------------------------- wrapper ------------------------------------
@jax.jit
def transformer_encoder(src_tokens, emb_table, pos_emb, wa, w2s, vecs):
    encoder_padding_mask = (src_tokens == PADDING_IDX)          # (B, S) bool
    pad_f = encoder_padding_mask.astype(jnp.float32)            # (B, S)
    keep_col = (1.0 - pad_f).reshape(BS, 1)                     # (BS, 1)

    # embedding: gather + scale + learned positional + pad-row zeroing (fuses with gather)
    tok = jnp.take(emb_table, src_tokens.reshape(-1), axis=0)   # (BS, D)
    x0 = (tok * EMBED_SCALE + jnp.tile(pos_emb, (B, 1))) * keep_col

    # additive attention bias: block-diagonal across batch + key padding (computed once)
    batch_id = jnp.arange(BS, dtype=jnp.int32) // S
    cross = (batch_id[:, None] != batch_id[None, :]).astype(jnp.float32)   # (BS, BS)
    attn_bias = cross * NEG + pad_f.reshape(1, BS) * NEG                    # (BS, BS)

    vmem = pl.BlockSpec(memory_space=pltpu.MemorySpace.VMEM)
    out = pl.pallas_call(
        encoder_kernel,
        out_shape=jax.ShapeDtypeStruct((BS, D), jnp.float32),
        in_specs=[vmem, vmem, vmem, vmem, vmem],
        out_specs=vmem,
        # no grid: single invocation, everything resident in VMEM (toy config)
    )(x0, attn_bias, wa, w2s, vecs)
    return out.reshape(B, S, D), encoder_padding_mask


# --------------------------- parameter init ----------------------------------
def init_params(key):
    keys = jax.random.split(key, 2 + NUM_LAYERS)

    def w(k, shape):
        return (0.02 * jax.random.normal(k, shape)).astype(jnp.float32)

    emb_table = w(keys[0], (VOCAB, D)).at[PADDING_IDX].set(0.0)   # nn.Embedding pad row = 0
    pos_emb = w(keys[1], (S, D))                                  # learned positional embedding

    layers = []
    for li in range(NUM_LAYERS):
        lk = jax.random.split(keys[2 + li], 12)
        ones, zeros = jnp.ones((1, D), jnp.float32), jnp.zeros((1, D), jnp.float32)
        layers.append(dict(
            wq=w(lk[0], (D, D)), bq=w(lk[6], (1, D)),
            wk=w(lk[1], (D, D)), bk=w(lk[7], (1, D)),
            wv=w(lk[2], (D, D)), bv=w(lk[8], (1, D)),
            wo=w(lk[3], (D, D)), bo=w(lk[9], (1, D)),
            g1=ones, b1=zeros,
            w1=w(lk[4], (D, FFN)), bf1=w(lk[10], (1, FFN)),
            w2=w(lk[5], (FFN, D)), bf2=w(lk[11], (1, D)),
            g2=ones, b2=zeros,
        ))
    final_ln = (jnp.ones((1, D), jnp.float32), jnp.zeros((1, D), jnp.float32))
    return emb_table, pos_emb, layers, final_ln


def pack_params(layers, final_ln):
    """Repack standard-layout weights into the consolidated kernel layout."""
    wa_list, w2_list, vec_list = [], [], []
    for p in layers:
        # fold attention scale into the query projection
        wq = p['wq'] * ATTN_SCALE
        bq = p['bq'] * ATTN_SCALE
        wqkv = jnp.concatenate([wq, p['wk'], p['wv']], axis=1)          # (D, 3D)
        bqkv = jnp.concatenate([bq, p['bk'], p['bv']], axis=1)          # (1, 3D)

        wa = jnp.zeros((D, WA_WIDTH), jnp.float32)
        wa = wa.at[:, OFF_QKV:OFF_QKV + 3 * D].set(wqkv)
        wa = wa.at[:, OFF_WO:OFF_WO + D].set(p['wo'])
        wa = wa.at[:, OFF_W1:OFF_W1 + FFN].set(p['w1'])
        wa_list.append(wa)
        w2_list.append(p['w2'])

        vec = jnp.zeros((8, VEC_WIDTH), jnp.float32)
        vec = vec.at[0, :3 * D].set(bqkv[0])
        vec = vec.at[1, :D].set(p['bo'][0])
        vec = vec.at[2, :D].set(p['g1'][0])
        vec = vec.at[3, :D].set(p['b1'][0])
        vec = vec.at[4, :D].set(p['g2'][0])
        vec = vec.at[5, :D].set(p['b2'][0])
        vec = vec.at[6, :FFN].set(p['bf1'][0])
        vec = vec.at[7, :D].set(p['bf2'][0])
        vec_list.append(vec)

    gf, bf = final_ln
    vec_f = jnp.zeros((8, VEC_WIDTH), jnp.float32)
    vec_f = vec_f.at[0, :D].set(gf[0])
    vec_f = vec_f.at[1, :D].set(bf[0])
    vec_list.append(vec_f)

    return jnp.stack(wa_list), jnp.stack(w2_list), jnp.stack(vec_list)


# ----------------------- pure-JAX reference (checking) -----------------------
def reference_forward(src_tokens, emb_table, pos_emb, layers, final_ln):
    pad = (src_tokens == PADDING_IDX)
    pad_f = pad.astype(jnp.float32)
    x = jnp.take(emb_table, src_tokens, axis=0) * EMBED_SCALE + pos_emb[None]   # (B,S,D)
    x = x * (1.0 - pad_f[..., None])
    for p in layers:
        residual = x
        h = _ln(x, p['g1'], p['b1'])
        q = h @ p['wq'] + p['bq']
        k = h @ p['wk'] + p['bk']
        v = h @ p['wv'] + p['bv']
        q = q.reshape(B, S, H, HD).transpose(0, 2, 1, 3)
        k = k.reshape(B, S, H, HD).transpose(0, 2, 1, 3)
        v = v.reshape(B, S, H, HD).transpose(0, 2, 1, 3)
        s = jnp.einsum('bhqd,bhkd->bhqk', q, k) * ATTN_SCALE
        s = s + (pad_f * NEG)[:, None, None, :]
        pa = jax.nn.softmax(s, axis=-1)
        o = jnp.einsum('bhqk,bhkd->bhqd', pa, v)
        o = o.transpose(0, 2, 1, 3).reshape(B, S, D)
        x = residual + (o @ p['wo'] + p['bo'])
        residual = x
        h = _ln(x, p['g2'], p['b2'])
        h = jnp.maximum(h @ p['w1'] + p['bf1'], 0.0)
        x = residual + (h @ p['w2'] + p['bf2'])
    gf, bf = final_ln
    return _ln(x, gf, bf), pad


# -------------------------------- main ----------------------------------------
if __name__ == "__main__":
    key = jax.random.PRNGKey(0)
    tok_key, param_key = jax.random.split(key)

    src_tokens = jax.random.randint(tok_key, (B, S), 2, VOCAB).astype(jnp.int32)
    src_tokens = src_tokens.at[1, 6:].set(PADDING_IDX)   # pad tail of 2nd sequence

    emb_table, pos_emb, layers, final_ln = init_params(param_key)
    wa, w2s, vecs = pack_params(layers, final_ln)

    x, mask = transformer_encoder(src_tokens, emb_table, pos_emb, wa, w2s, vecs)
    jax.block_until_ready(x)

    x_ref, mask_ref = reference_forward(src_tokens, emb_table, pos_emb, layers, final_ln)

    assert x.shape == (B, S, D) and x.dtype == jnp.float32
    assert mask.shape == (B, S) and mask.dtype == jnp.bool_
    assert bool(jnp.all(jnp.isfinite(x)))
    assert bool(jnp.all(mask == mask_ref))
    max_err = float(jnp.max(jnp.abs(x - x_ref)))
    assert max_err < 5e-2, f"kernel/reference mismatch: {max_err}"
    print("KERNEL_OK")
</pallas_src>

<mosaic_0001>
module attributes {stable_mosaic.version = 11 : i64} {
  func.func @encoder_kernel(%arg0: memref<16x32xf32, #tpu.memory_space<vmem>>, %arg1: memref<16x16xf32, #tpu.memory_space<vmem>>, %arg2: memref<2x32x384xf32, #tpu.memory_space<vmem>>, %arg3: memref<2x64x32xf32, #tpu.memory_space<vmem>>, %arg4: memref<3x8x96xf32, #tpu.memory_space<vmem>>, %arg5: memref<16x32xf32, #tpu.memory_space<vmem>>) attributes {dimension_semantics = [], scalar_prefetch = 0 : i64, scratch_operands = 0 : i64, tpu.core_type = #tpu.core_type<tc>} {
    %c0 = arith.constant 0 : index
    %c0_0 = arith.constant 0 : index
    %0 = vector.load %arg0[%c0, %c0_0] : memref<16x32xf32, #tpu.memory_space<vmem>>, vector<16x32xf32>
    %c0_1 = arith.constant 0 : index
    %c0_2 = arith.constant 0 : index
    %1 = vector.load %arg1[%c0_1, %c0_2] : memref<16x16xf32, #tpu.memory_space<vmem>>, vector<16x16xf32>
    %c0_3 = arith.constant 0 : index
    %c0_4 = arith.constant 0 : index
    %c0_5 = arith.constant 0 : index
    %2 = vector.load %arg2[%c0_3, %c0_4, %c0_5] : memref<2x32x384xf32, #tpu.memory_space<vmem>>, vector<1x32x96xf32>
    %3 = vector.shape_cast %2 : vector<1x32x96xf32> to vector<32x96xf32>
    %c0_6 = arith.constant 0 : index
    %c0_7 = arith.constant 0 : index
    %c128 = arith.constant 128 : index
    %4 = vector.load %arg2[%c0_6, %c0_7, %c128] : memref<2x32x384xf32, #tpu.memory_space<vmem>>, vector<1x32x32xf32>
    %5 = vector.shape_cast %4 : vector<1x32x32xf32> to vector<32x32xf32>
    %c0_8 = arith.constant 0 : index
    %c0_9 = arith.constant 0 : index
    %c256 = arith.constant 256 : index
    %6 = vector.load %arg2[%c0_8, %c0_9, %c256] : memref<2x32x384xf32, #tpu.memory_space<vmem>>, vector<1x32x64xf32>
    %7 = vector.shape_cast %6 : vector<1x32x64xf32> to vector<32x64xf32>
    %c0_10 = arith.constant 0 : index
    %c0_11 = arith.constant 0 : index
    %c0_12 = arith.constant 0 : index
    %8 = vector.load %arg3[%c0_10, %c0_11, %c0_12] : memref<2x64x32xf32, #tpu.memory_space<vmem>>, vector<1x64x32xf32>
    %9 = vector.shape_cast %8 : vector<1x64x32xf32> to vector<64x32xf32>
    %c0_13 = arith.constant 0 : index
    %c0_14 = arith.constant 0 : index
    %c0_15 = arith.constant 0 : index
    %10 = vector.load %arg4[%c0_13, %c0_14, %c0_15] : memref<3x8x96xf32, #tpu.memory_space<vmem>>, vector<1x1x96xf32>
    %11 = vector.shape_cast %10 : vector<1x1x96xf32> to vector<1x96xf32>
    %c0_16 = arith.constant 0 : index
    %c1 = arith.constant 1 : index
    %c0_17 = arith.constant 0 : index
    %12 = vector.load %arg4[%c0_16, %c1, %c0_17] : memref<3x8x96xf32, #tpu.memory_space<vmem>>, vector<1x1x32xf32>
    %13 = vector.shape_cast %12 : vector<1x1x32xf32> to vector<1x32xf32>
    %c0_18 = arith.constant 0 : index
    %c2 = arith.constant 2 : index
    %c0_19 = arith.constant 0 : index
    %14 = vector.load %arg4[%c0_18, %c2, %c0_19] : memref<3x8x96xf32, #tpu.memory_space<vmem>>, vector<1x1x32xf32>
    %15 = vector.shape_cast %14 : vector<1x1x32xf32> to vector<1x32xf32>
    %c0_20 = arith.constant 0 : index
    %c3 = arith.constant 3 : index
    %c0_21 = arith.constant 0 : index
    %16 = vector.load %arg4[%c0_20, %c3, %c0_21] : memref<3x8x96xf32, #tpu.memory_space<vmem>>, vector<1x1x32xf32>
    %17 = vector.shape_cast %16 : vector<1x1x32xf32> to vector<1x32xf32>
    %c0_22 = arith.constant 0 : index
    %c4 = arith.constant 4 : index
    %c0_23 = arith.constant 0 : index
    %18 = vector.load %arg4[%c0_22, %c4, %c0_23] : memref<3x8x96xf32, #tpu.memory_space<vmem>>, vector<1x1x32xf32>
    %19 = vector.shape_cast %18 : vector<1x1x32xf32> to vector<1x32xf32>
    %c0_24 = arith.constant 0 : index
    %c5 = arith.constant 5 : index
    %c0_25 = arith.constant 0 : index
    %20 = vector.load %arg4[%c0_24, %c5, %c0_25] : memref<3x8x96xf32, #tpu.memory_space<vmem>>, vector<1x1x32xf32>
    %21 = vector.shape_cast %20 : vector<1x1x32xf32> to vector<1x32xf32>
    %c0_26 = arith.constant 0 : index
    %c6 = arith.constant 6 : index
    %c0_27 = arith.constant 0 : index
    %22 = vector.load %arg4[%c0_26, %c6, %c0_27] : memref<3x8x96xf32, #tpu.memory_space<vmem>>, vector<1x1x64xf32>
    %23 = vector.shape_cast %22 : vector<1x1x64xf32> to vector<1x64xf32>
    %c0_28 = arith.constant 0 : index
    %c7 = arith.constant 7 : index
    %c0_29 = arith.constant 0 : index
    %24 = vector.load %arg4[%c0_28, %c7, %c0_29] : memref<3x8x96xf32, #tpu.memory_space<vmem>>, vector<1x1x32xf32>
    %25 = vector.shape_cast %24 : vector<1x1x32xf32> to vector<1x32xf32>
    %cst = arith.constant dense<0.000000e+00> : vector<16xf32>
    %26 = vector.multi_reduction <add>, %0, %cst [1] : vector<16x32xf32> to vector<16xf32>
    %27 = vector.shape_cast %26 : vector<16xf32> to vector<16x1xf32>
    %cst_30 = arith.constant 3.200000e+01 : f32
    %28 = vector.broadcast %cst_30 : f32 to vector<16x1xf32>
    %29 = arith.divf %27, %28 : vector<16x1xf32>
    %30 = vector.broadcast %29 : vector<16x1xf32> to vector<16x32xf32>
    %31 = arith.subf %0, %30 : vector<16x32xf32>
    %32 = arith.mulf %31, %31 : vector<16x32xf32>
    %cst_31 = arith.constant dense<0.000000e+00> : vector<16xf32>
    %33 = vector.multi_reduction <add>, %32, %cst_31 [1] : vector<16x32xf32> to vector<16xf32>
    %34 = vector.shape_cast %33 : vector<16xf32> to vector<16x1xf32>
    %cst_32 = arith.constant 3.200000e+01 : f32
    %35 = vector.broadcast %cst_32 : f32 to vector<16x1xf32>
    %36 = arith.divf %34, %35 : vector<16x1xf32>
    %37 = vector.broadcast %29 : vector<16x1xf32> to vector<16x32xf32>
    %38 = arith.subf %0, %37 : vector<16x32xf32>
    %cst_33 = arith.constant 9.99999974E-6 : f32
    %39 = vector.broadcast %cst_33 : f32 to vector<16x1xf32>
    %40 = arith.addf %36, %39 : vector<16x1xf32>
    %41 = math.rsqrt %40 : vector<16x1xf32>
    %42 = vector.broadcast %41 : vector<16x1xf32> to vector<16x32xf32>
    %43 = arith.mulf %38, %42 : vector<16x32xf32>
    %44 = vector.broadcast %15 : vector<1x32xf32> to vector<16x32xf32>
    %45 = arith.mulf %43, %44 : vector<16x32xf32>
    %46 = vector.broadcast %17 : vector<1x32xf32> to vector<16x32xf32>
    %47 = arith.addf %45, %46 : vector<16x32xf32>
    %cst_34 = arith.constant dense<0.000000e+00> : vector<16x96xf32>
    %48 = tpu.matmul %47, %3, %cst_34 {dimension_numbers = #tpu.dot_dimension_numbers<[1], [0], [0], [1], [0, 0, 1, 1], [], []>} : vector<16x32xf32>, vector<32x96xf32>, vector<16x96xf32> -> vector<16x96xf32>
    %49 = vector.broadcast %11 : vector<1x96xf32> to vector<16x96xf32>
    %50 = arith.addf %48, %49 : vector<16x96xf32>
    %51 = vector.extract_strided_slice %50 {offsets = [0, 0], sizes = [16, 8], strides = [1, 1]} : vector<16x96xf32> to vector<16x8xf32>
    %52 = vector.extract_strided_slice %50 {offsets = [0, 32], sizes = [16, 8], strides = [1, 1]} : vector<16x96xf32> to vector<16x8xf32>
    %53 = vector.extract_strided_slice %50 {offsets = [0, 64], sizes = [16, 8], strides = [1, 1]} : vector<16x96xf32> to vector<16x8xf32>
    "tpu.trace_start"() <{level = 10 : i32, message = "qd,kd->qk"}> : () -> ()
    %cst_35 = arith.constant dense<0.000000e+00> : vector<16x16xf32>
    %54 = tpu.matmul %51, %52, %cst_35 {dimension_numbers = #tpu.dot_dimension_numbers<[1], [1], [0], [0], [0, 0, 1, 0], [], []>} : vector<16x8xf32>, vector<16x8xf32>, vector<16x16xf32> -> vector<16x16xf32>
    "tpu.trace_stop"() : () -> ()
    %55 = arith.addf %54, %1 : vector<16x16xf32>
    %cst_36 = arith.constant dense<0xFF800000> : vector<16xf32>
    %56 = vector.multi_reduction <maximumf>, %55, %cst_36 [1] : vector<16x16xf32> to vector<16xf32>
    %57 = vector.shape_cast %56 : vector<16xf32> to vector<16x1xf32>
    %58 = vector.broadcast %57 : vector<16x1xf32> to vector<16x16xf32>
    %59 = arith.subf %55, %58 : vector<16x16xf32>
    %60 = math.exp %59 : vector<16x16xf32>
    %cst_37 = arith.constant dense<0.000000e+00> : vector<16xf32>
    %61 = vector.multi_reduction <add>, %60, %cst_37 [1] : vector<16x16xf32> to vector<16xf32>
    %62 = vector.shape_cast %61 : vector<16xf32> to vector<16x1xf32>
    %63 = tpu.reciprocal %62 {approx = true} : vector<16x1xf32> -> vector<16x1xf32>
    %64 = vector.broadcast %63 : vector<16x1xf32> to vector<16x16xf32>
    %65 = arith.mulf %60, %64 : vector<16x16xf32>
    %cst_38 = arith.constant dense<0.000000e+00> : vector<16x8xf32>
    %66 = tpu.matmul %65, %53, %cst_38 {dimension_numbers = #tpu.dot_dimension_numbers<[1], [0], [0], [1], [0, 0, 1, 1], [], []>} : vector<16x16xf32>, vector<16x8xf32>, vector<16x8xf32> -> vector<16x8xf32>
    %67 = vector.extract_strided_slice %50 {offsets = [0, 8], sizes = [16, 8], strides = [1, 1]} : vector<16x96xf32> to vector<16x8xf32>
    %68 = vector.extract_strided_slice %50 {offsets = [0, 40], sizes = [16, 8], strides = [1, 1]} : vector<16x96xf32> to vector<16x8xf32>
    %69 = vector.extract_strided_slice %50 {offsets = [0, 72], sizes = [16, 8], strides = [1, 1]} : vector<16x96xf32> to vector<16x8xf32>
    "tpu.trace_start"() <{level = 10 : i32, message = "qd,kd->qk"}> : () -> ()
    %cst_39 = arith.constant dense<0.000000e+00> : vector<16x16xf32>
    %70 = tpu.matmul %67, %68, %cst_39 {dimension_numbers = #tpu.dot_dimension_numbers<[1], [1], [0], [0], [0, 0, 1, 0], [], []>} : vector<16x8xf32>, vector<16x8xf32>, vector<16x16xf32> -> vector<16x16xf32>
    "tpu.trace_stop"() : () -> ()
    %71 = arith.addf %70, %1 : vector<16x16xf32>
    %cst_40 = arith.constant dense<0xFF800000> : vector<16xf32>
    %72 = vector.multi_reduction <maximumf>, %71, %cst_40 [1] : vector<16x16xf32> to vector<16xf32>
    %73 = vector.shape_cast %72 : vector<16xf32> to vector<16x1xf32>
    %74 = vector.broadcast %73 : vector<16x1xf32> to vector<16x16xf32>
    %75 = arith.subf %71, %74 : vector<16x16xf32>
    %76 = math.exp %75 : vector<16x16xf32>
    %cst_41 = arith.constant dense<0.000000e+00> : vector<16xf32>
    %77 = vector.multi_reduction <add>, %76, %cst_41 [1] : vector<16x16xf32> to vector<16xf32>
    %78 = vector.shape_cast %77 : vector<16xf32> to vector<16x1xf32>
    %79 = tpu.reciprocal %78 {approx = true} : vector<16x1xf32> -> vector<16x1xf32>
    %80 = vector.broadcast %79 : vector<16x1xf32> to vector<16x16xf32>
    %81 = arith.mulf %76, %80 : vector<16x16xf32>
    %cst_42 = arith.constant dense<0.000000e+00> : vector<16x8xf32>
    %82 = tpu.matmul %81, %69, %cst_42 {dimension_numbers = #tpu.dot_dimension_numbers<[1], [0], [0], [1], [0, 0, 1, 1], [], []>} : vector<16x16xf32>, vector<16x8xf32>, vector<16x8xf32> -> vector<16x8xf32>
    %83 = vector.extract_strided_slice %50 {offsets = [0, 16], sizes = [16, 8], strides = [1, 1]} : vector<16x96xf32> to vector<16x8xf32>
    %84 = vector.extract_strided_slice %50 {offsets = [0, 48], sizes = [16, 8], strides = [1, 1]} : vector<16x96xf32> to vector<16x8xf32>
    %85 = vector.extract_strided_slice %50 {offsets = [0, 80], sizes = [16, 8], strides = [1, 1]} : vector<16x96xf32> to vector<16x8xf32>
    "tpu.trace_start"() <{level = 10 : i32, message = "qd,kd->qk"}> : () -> ()
    %cst_43 = arith.constant dense<0.000000e+00> : vector<16x16xf32>
    %86 = tpu.matmul %83, %84, %cst_43 {dimension_numbers = #tpu.dot_dimension_numbers<[1], [1], [0], [0], [0, 0, 1, 0], [], []>} : vector<16x8xf32>, vector<16x8xf32>, vector<16x16xf32> -> vector<16x16xf32>
    "tpu.trace_stop"() : () -> ()
    %87 = arith.addf %86, %1 : vector<16x16xf32>
    %cst_44 = arith.constant dense<0xFF800000> : vector<16xf32>
    %88 = vector.multi_reduction <maximumf>, %87, %cst_44 [1] : vector<16x16xf32> to vector<16xf32>
    %89 = vector.shape_cast %88 : vector<16xf32> to vector<16x1xf32>
    %90 = vector.broadcast %89 : vector<16x1xf32> to vector<16x16xf32>
    %91 = arith.subf %87, %90 : vector<16x16xf32>
    %92 = math.exp %91 : vector<16x16xf32>
    %cst_45 = arith.constant dense<0.000000e+00> : vector<16xf32>
    %93 = vector.multi_reduction <add>, %92, %cst_45 [1] : vector<16x16xf32> to vector<16xf32>
    %94 = vector.shape_cast %93 : vector<16xf32> to vector<16x1xf32>
    %95 = tpu.reciprocal %94 {approx = true} : vector<16x1xf32> -> vector<16x1xf32>
    %96 = vector.broadcast %95 : vector<16x1xf32> to vector<16x16xf32>
    %97 = arith.mulf %92, %96 : vector<16x16xf32>
    %cst_46 = arith.constant dense<0.000000e+00> : vector<16x8xf32>
    %98 = tpu.matmul %97, %85, %cst_46 {dimension_numbers = #tpu.dot_dimension_numbers<[1], [0], [0], [1], [0, 0, 1, 1], [], []>} : vector<16x16xf32>, vector<16x8xf32>, vector<16x8xf32> -> vector<16x8xf32>
    %99 = vector.extract_strided_slice %50 {offsets = [0, 24], sizes = [16, 8], strides = [1, 1]} : vector<16x96xf32> to vector<16x8xf32>
    %100 = vector.extract_strided_slice %50 {offsets = [0, 56], sizes = [16, 8], strides = [1, 1]} : vector<16x96xf32> to vector<16x8xf32>
    %101 = vector.extract_strided_slice %50 {offsets = [0, 88], sizes = [16, 8], strides = [1, 1]} : vector<16x96xf32> to vector<16x8xf32>
    "tpu.trace_start"() <{level = 10 : i32, message = "qd,kd->qk"}> : () -> ()
    %cst_47 = arith.constant dense<0.000000e+00> : vector<16x16xf32>
    %102 = tpu.matmul %99, %100, %cst_47 {dimension_numbers = #tpu.dot_dimension_numbers<[1], [1], [0], [0], [0, 0, 1, 0], [], []>} : vector<16x8xf32>, vector<16x8xf32>, vector<16x16xf32> -> vector<16x16xf32>
    "tpu.trace_stop"() : () -> ()
    %103 = arith.addf %102, %1 : vector<16x16xf32>
    %cst_48 = arith.constant dense<0xFF800000> : vector<16xf32>
    %104 = vector.multi_reduction <maximumf>, %103, %cst_48 [1] : vector<16x16xf32> to vector<16xf32>
    %105 = vector.shape_cast %104 : vector<16xf32> to vector<16x1xf32>
    %106 = vector.broadcast %105 : vector<16x1xf32> to vector<16x16xf32>
    %107 = arith.subf %103, %106 : vector<16x16xf32>
    %108 = math.exp %107 : vector<16x16xf32>
    %cst_49 = arith.constant dense<0.000000e+00> : vector<16xf32>
    %109 = vector.multi_reduction <add>, %108, %cst_49 [1] : vector<16x16xf32> to vector<16xf32>
    %110 = vector.shape_cast %109 : vector<16xf32> to vector<16x1xf32>
    %111 = tpu.reciprocal %110 {approx = true} : vector<16x1xf32> -> vector<16x1xf32>
    %112 = vector.broadcast %111 : vector<16x1xf32> to vector<16x16xf32>
    %113 = arith.mulf %108, %112 : vector<16x16xf32>
    %cst_50 = arith.constant dense<0.000000e+00> : vector<16x8xf32>
    %114 = tpu.matmul %113, %101, %cst_50 {dimension_numbers = #tpu.dot_dimension_numbers<[1], [0], [0], [1], [0, 0, 1, 1], [], []>} : vector<16x16xf32>, vector<16x8xf32>, vector<16x8xf32> -> vector<16x8xf32>
    %115 = tpu.concatenate %66, %82, %98, %114 in 1 : vector<16x8xf32>, vector<16x8xf32>, vector<16x8xf32>, vector<16x8xf32> -> vector<16x32xf32>
    %cst_51 = arith.constant dense<0.000000e+00> : vector<16x32xf32>
    %116 = tpu.matmul %115, %5, %cst_51 {dimension_numbers = #tpu.dot_dimension_numbers<[1], [0], [0], [1], [0, 0, 1, 1], [], []>} : vector<16x32xf32>, vector<32x32xf32>, vector<16x32xf32> -> vector<16x32xf32>
    %117 = vector.broadcast %13 : vector<1x32xf32> to vector<16x32xf32>
    %118 = arith.addf %116, %117 : vector<16x32xf32>
    %119 = arith.addf %0, %118 : vector<16x32xf32>
    %cst_52 = arith.constant dense<0.000000e+00> : vector<16xf32>
    %120 = vector.multi_reduction <add>, %119, %cst_52 [1] : vector<16x32xf32> to vector<16xf32>
    %121 = vector.shape_cast %120 : vector<16xf32> to vector<16x1xf32>
    %cst_53 = arith.constant 3.200000e+01 : f32
    %122 = vector.broadcast %cst_53 : f32 to vector<16x1xf32>
    %123 = arith.divf %121, %122 : vector<16x1xf32>
    %124 = vector.broadcast %123 : vector<16x1xf32> to vector<16x32xf32>
    %125 = arith.subf %119, %124 : vector<16x32xf32>
    %126 = arith.mulf %125, %125 : vector<16x32xf32>
    %cst_54 = arith.constant dense<0.000000e+00> : vector<16xf32>
    %127 = vector.multi_reduction <add>, %126, %cst_54 [1] : vector<16x32xf32> to vector<16xf32>
    %128 = vector.shape_cast %127 : vector<16xf32> to vector<16x1xf32>
    %cst_55 = arith.constant 3.200000e+01 : f32
    %129 = vector.broadcast %cst_55 : f32 to vector<16x1xf32>
    %130 = arith.divf %128, %129 : vector<16x1xf32>
    %131 = vector.broadcast %123 : vector<16x1xf32> to vector<16x32xf32>
    %132 = arith.subf %119, %131 : vector<16x32xf32>
    %cst_56 = arith.constant 9.99999974E-6 : f32
    %133 = vector.broadcast %cst_56 : f32 to vector<16x1xf32>
    %134 = arith.addf %130, %133 : vector<16x1xf32>
    %135 = math.rsqrt %134 : vector<16x1xf32>
    %136 = vector.broadcast %135 : vector<16x1xf32> to vector<16x32xf32>
    %137 = arith.mulf %132, %136 : vector<16x32xf32>
    %138 = vector.broadcast %19 : vector<1x32xf32> to vector<16x32xf32>
    %139 = arith.mulf %137, %138 : vector<16x32xf32>
    %140 = vector.broadcast %21 : vector<1x32xf32> to vector<16x32xf32>
    %141 = arith.addf %139, %140 : vector<16x32xf32>
    %cst_57 = arith.constant dense<0.000000e+00> : vector<16x64xf32>
    %142 = tpu.matmul %141, %7, %cst_57 {dimension_numbers = #tpu.dot_dimension_numbers<[1], [0], [0], [1], [0, 0, 1, 1], [], []>} : vector<16x32xf32>, vector<32x64xf32>, vector<16x64xf32> -> vector<16x64xf32>
    %143 = vector.broadcast %23 : vector<1x64xf32> to vector<16x64xf32>
    %144 = arith.addf %142, %143 : vector<16x64xf32>
    %cst_58 = arith.constant 0.000000e+00 : f32
    %145 = vector.broadcast %cst_58 : f32 to vector<16x64xf32>
    %146 = arith.maximumf %144, %145 : vector<16x64xf32>
    %cst_59 = arith.constant dense<0.000000e+00> : vector<16x32xf32>
    %147 = tpu.matmul %146, %9, %cst_59 {dimension_numbers = #tpu.dot_dimension_numbers<[1], [0], [0], [1], [0, 0, 1, 1], [], []>} : vector<16x64xf32>, vector<64x32xf32>, vector<16x32xf32> -> vector<16x32xf32>
    %148 = vector.broadcast %25 : vector<1x32xf32> to vector<16x32xf32>
    %149 = arith.addf %147, %148 : vector<16x32xf32>
    %150 = arith.addf %119, %149 : vector<16x32xf32>
    %c1_60 = arith.constant 1 : index
    %c0_61 = arith.constant 0 : index
    %c0_62 = arith.constant 0 : index
    %151 = vector.load %arg2[%c1_60, %c0_61, %c0_62] : memref<2x32x384xf32, #tpu.memory_space<vmem>>, vector<1x32x96xf32>
    %152 = vector.shape_cast %151 : vector<1x32x96xf32> to vector<32x96xf32>
    %c1_63 = arith.constant 1 : index
    %c0_64 = arith.constant 0 : index
    %c128_65 = arith.constant 128 : index
    %153 = vector.load %arg2[%c1_63, %c0_64, %c128_65] : memref<2x32x384xf32, #tpu.memory_space<vmem>>, vector<1x32x32xf32>
    %154 = vector.shape_cast %153 : vector<1x32x32xf32> to vector<32x32xf32>
    %c1_66 = arith.constant 1 : index
    %c0_67 = arith.constant 0 : index
    %c256_68 = arith.constant 256 : index
    %155 = vector.load %arg2[%c1_66, %c0_67, %c256_68] : memref<2x32x384xf32, #tpu.memory_space<vmem>>, vector<1x32x64xf32>
    %156 = vector.shape_cast %155 : vector<1x32x64xf32> to vector<32x64xf32>
    %c1_69 = arith.constant 1 : index
    %c0_70 = arith.constant 0 : index
    %c0_71 = arith.constant 0 : index
    %157 = vector.load %arg3[%c1_69, %c0_70, %c0_71] : memref<2x64x32xf32, #tpu.memory_space<vmem>>, vector<1x64x32xf32>
    %158 = vector.shape_cast %157 : vector<1x64x32xf32> to vector<64x32xf32>
    %c1_72 = arith.constant 1 : index
    %c0_73 = arith.constant 0 : index
    %c0_74 = arith.constant 0 : index
    %159 = vector.load %arg4[%c1_72, %c0_73, %c0_74] : memref<3x8x96xf32, #tpu.memory_space<vmem>>, vector<1x1x96xf32>
    %160 = vector.shape_cast %159 : vector<1x1x96xf32> to vector<1x96xf32>
    %c1_75 = arith.constant 1 : index
    %c1_76 = arith.constant 1 : index
    %c0_77 = arith.constant 0 : index
    %161 = vector.load %arg4[%c1_75, %c1_76, %c0_77] : memref<3x8x96xf32, #tpu.memory_space<vmem>>, vector<1x1x32xf32>
    %162 = vector.shape_cast %161 : vector<1x1x32xf32> to vector<1x32xf32>
    %c1_78 = arith.constant 1 : index
    %c2_79 = arith.constant 2 : index
    %c0_80 = arith.constant 0 : index
    %163 = vector.load %arg4[%c1_78, %c2_79, %c0_80] : memref<3x8x96xf32, #tpu.memory_space<vmem>>, vector<1x1x32xf32>
    %164 = vector.shape_cast %163 : vector<1x1x32xf32> to vector<1x32xf32>
    %c1_81 = arith.constant 1 : index
    %c3_82 = arith.constant 3 : index
    %c0_83 = arith.constant 0 : index
    %165 = vector.load %arg4[%c1_81, %c3_82, %c0_83] : memref<3x8x96xf32, #tpu.memory_space<vmem>>, vector<1x1x32xf32>
    %166 = vector.shape_cast %165 : vector<1x1x32xf32> to vector<1x32xf32>
    %c1_84 = arith.constant 1 : index
    %c4_85 = arith.constant 4 : index
    %c0_86 = arith.constant 0 : index
    %167 = vector.load %arg4[%c1_84, %c4_85, %c0_86] : memref<3x8x96xf32, #tpu.memory_space<vmem>>, vector<1x1x32xf32>
    %168 = vector.shape_cast %167 : vector<1x1x32xf32> to vector<1x32xf32>
    %c1_87 = arith.constant 1 : index
    %c5_88 = arith.constant 5 : index
    %c0_89 = arith.constant 0 : index
    %169 = vector.load %arg4[%c1_87, %c5_88, %c0_89] : memref<3x8x96xf32, #tpu.memory_space<vmem>>, vector<1x1x32xf32>
    %170 = vector.shape_cast %169 : vector<1x1x32xf32> to vector<1x32xf32>
    %c1_90 = arith.constant 1 : index
    %c6_91 = arith.constant 6 : index
    %c0_92 = arith.constant 0 : index
    %171 = vector.load %arg4[%c1_90, %c6_91, %c0_92] : memref<3x8x96xf32, #tpu.memory_space<vmem>>, vector<1x1x64xf32>
    %172 = vector.shape_cast %171 : vector<1x1x64xf32> to vector<1x64xf32>
    %c1_93 = arith.constant 1 : index
    %c7_94 = arith.constant 7 : index
    %c0_95 = arith.constant 0 : index
    %173 = vector.load %arg4[%c1_93, %c7_94, %c0_95] : memref<3x8x96xf32, #tpu.memory_space<vmem>>, vector<1x1x32xf32>
    %174 = vector.shape_cast %173 : vector<1x1x32xf32> to vector<1x32xf32>
    %cst_96 = arith.constant dense<0.000000e+00> : vector<16xf32>
    %175 = vector.multi_reduction <add>, %150, %cst_96 [1] : vector<16x32xf32> to vector<16xf32>
    %176 = vector.shape_cast %175 : vector<16xf32> to vector<16x1xf32>
    %cst_97 = arith.constant 3.200000e+01 : f32
    %177 = vector.broadcast %cst_97 : f32 to vector<16x1xf32>
    %178 = arith.divf %176, %177 : vector<16x1xf32>
    %179 = vector.broadcast %178 : vector<16x1xf32> to vector<16x32xf32>
    %180 = arith.subf %150, %179 : vector<16x32xf32>
    %181 = arith.mulf %180, %180 : vector<16x32xf32>
    %cst_98 = arith.constant dense<0.000000e+00> : vector<16xf32>
    %182 = vector.multi_reduction <add>, %181, %cst_98 [1] : vector<16x32xf32> to vector<16xf32>
    %183 = vector.shape_cast %182 : vector<16xf32> to vector<16x1xf32>
    %cst_99 = arith.constant 3.200000e+01 : f32
    %184 = vector.broadcast %cst_99 : f32 to vector<16x1xf32>
    %185 = arith.divf %183, %184 : vector<16x1xf32>
    %186 = vector.broadcast %178 : vector<16x1xf32> to vector<16x32xf32>
    %187 = arith.subf %150, %186 : vector<16x32xf32>
    %cst_100 = arith.constant 9.99999974E-6 : f32
    %188 = vector.broadcast %cst_100 : f32 to vector<16x1xf32>
    %189 = arith.addf %185, %188 : vector<16x1xf32>
    %190 = math.rsqrt %189 : vector<16x1xf32>
    %191 = vector.broadcast %190 : vector<16x1xf32> to vector<16x32xf32>
    %192 = arith.mulf %187, %191 : vector<16x32xf32>
    %193 = vector.broadcast %164 : vector<1x32xf32> to vector<16x32xf32>
    %194 = arith.mulf %192, %193 : vector<16x32xf32>
    %195 = vector.broadcast %166 : vector<1x32xf32> to vector<16x32xf32>
    %196 = arith.addf %194, %195 : vector<16x32xf32>
    %cst_101 = arith.constant dense<0.000000e+00> : vector<16x96xf32>
    %197 = tpu.matmul %196, %152, %cst_101 {dimension_numbers = #tpu.dot_dimension_numbers<[1], [0], [0], [1], [0, 0, 1, 1], [], []>} : vector<16x32xf32>, vector<32x96xf32>, vector<16x96xf32> -> vector<16x96xf32>
    %198 = vector.broadcast %160 : vector<1x96xf32> to vector<16x96xf32>
    %199 = arith.addf %197, %198 : vector<16x96xf32>
    %200 = vector.extract_strided_slice %199 {offsets = [0, 0], sizes = [16, 8], strides = [1, 1]} : vector<16x96xf32> to vector<16x8xf32>
    %201 = vector.extract_strided_slice %199 {offsets = [0, 32], sizes = [16, 8], strides = [1, 1]} : vector<16x96xf32> to vector<16x8xf32>
    %202 = vector.extract_strided_slice %199 {offsets = [0, 64], sizes = [16, 8], strides = [1, 1]} : vector<16x96xf32> to vector<16x8xf32>
    "tpu.trace_start"() <{level = 10 : i32, message = "qd,kd->qk"}> : () -> ()
    %cst_102 = arith.constant dense<0.000000e+00> : vector<16x16xf32>
    %203 = tpu.matmul %200, %201, %cst_102 {dimension_numbers = #tpu.dot_dimension_numbers<[1], [1], [0], [0], [0, 0, 1, 0], [], []>} : vector<16x8xf32>, vector<16x8xf32>, vector<16x16xf32> -> vector<16x16xf32>
    "tpu.trace_stop"() : () -> ()
    %204 = arith.addf %203, %1 : vector<16x16xf32>
    %cst_103 = arith.constant dense<0xFF800000> : vector<16xf32>
    %205 = vector.multi_reduction <maximumf>, %204, %cst_103 [1] : vector<16x16xf32> to vector<16xf32>
    %206 = vector.shape_cast %205 : vector<16xf32> to vector<16x1xf32>
    %207 = vector.broadcast %206 : vector<16x1xf32> to vector<16x16xf32>
    %208 = arith.subf %204, %207 : vector<16x16xf32>
    %209 = math.exp %208 : vector<16x16xf32>
    %cst_104 = arith.constant dense<0.000000e+00> : vector<16xf32>
    %210 = vector.multi_reduction <add>, %209, %cst_104 [1] : vector<16x16xf32> to vector<16xf32>
    %211 = vector.shape_cast %210 : vector<16xf32> to vector<16x1xf32>
    %212 = tpu.reciprocal %211 {approx = true} : vector<16x1xf32> -> vector<16x1xf32>
    %213 = vector.broadcast %212 : vector<16x1xf32> to vector<16x16xf32>
    %214 = arith.mulf %209, %213 : vector<16x16xf32>
    %cst_105 = arith.constant dense<0.000000e+00> : vector<16x8xf32>
    %215 = tpu.matmul %214, %202, %cst_105 {dimension_numbers = #tpu.dot_dimension_numbers<[1], [0], [0], [1], [0, 0, 1, 1], [], []>} : vector<16x16xf32>, vector<16x8xf32>, vector<16x8xf32> -> vector<16x8xf32>
    %216 = vector.extract_strided_slice %199 {offsets = [0, 8], sizes = [16, 8], strides = [1, 1]} : vector<16x96xf32> to vector<16x8xf32>
    %217 = vector.extract_strided_slice %199 {offsets = [0, 40], sizes = [16, 8], strides = [1, 1]} : vector<16x96xf32> to vector<16x8xf32>
    %218 = vector.extract_strided_slice %199 {offsets = [0, 72], sizes = [16, 8], strides = [1, 1]} : vector<16x96xf32> to vector<16x8xf32>
    "tpu.trace_start"() <{level = 10 : i32, message = "qd,kd->qk"}> : () -> ()
    %cst_106 = arith.constant dense<0.000000e+00> : vector<16x16xf32>
    %219 = tpu.matmul %216, %217, %cst_106 {dimension_numbers = #tpu.dot_dimension_numbers<[1], [1], [0], [0], [0, 0, 1, 0], [], []>} : vector<16x8xf32>, vector<16x8xf32>, vector<16x16xf32> -> vector<16x16xf32>
    "tpu.trace_stop"() : () -> ()
    %220 = arith.addf %219, %1 : vector<16x16xf32>
    %cst_107 = arith.constant dense<0xFF800000> : vector<16xf32>
    %221 = vector.multi_reduction <maximumf>, %220, %cst_107 [1] : vector<16x16xf32> to vector<16xf32>
    %222 = vector.shape_cast %221 : vector<16xf32> to vector<16x1xf32>
    %223 = vector.broadcast %222 : vector<16x1xf32> to vector<16x16xf32>
    %224 = arith.subf %220, %223 : vector<16x16xf32>
    %225 = math.exp %224 : vector<16x16xf32>
    %cst_108 = arith.constant dense<0.000000e+00> : vector<16xf32>
    %226 = vector.multi_reduction <add>, %225, %cst_108 [1] : vector<16x16xf32> to vector<16xf32>
    %227 = vector.shape_cast %226 : vector<16xf32> to vector<16x1xf32>
    %228 = tpu.reciprocal %227 {approx = true} : vector<16x1xf32> -> vector<16x1xf32>
    %229 = vector.broadcast %228 : vector<16x1xf32> to vector<16x16xf32>
    %230 = arith.mulf %225, %229 : vector<16x16xf32>
    %cst_109 = arith.constant dense<0.000000e+00> : vector<16x8xf32>
    %231 = tpu.matmul %230, %218, %cst_109 {dimension_numbers = #tpu.dot_dimension_numbers<[1], [0], [0], [1], [0, 0, 1, 1], [], []>} : vector<16x16xf32>, vector<16x8xf32>, vector<16x8xf32> -> vector<16x8xf32>
    %232 = vector.extract_strided_slice %199 {offsets = [0, 16], sizes = [16, 8], strides = [1, 1]} : vector<16x96xf32> to vector<16x8xf32>
    %233 = vector.extract_strided_slice %199 {offsets = [0, 48], sizes = [16, 8], strides = [1, 1]} : vector<16x96xf32> to vector<16x8xf32>
    %234 = vector.extract_strided_slice %199 {offsets = [0, 80], sizes = [16, 8], strides = [1, 1]} : vector<16x96xf32> to vector<16x8xf32>
    "tpu.trace_start"() <{level = 10 : i32, message = "qd,kd->qk"}> : () -> ()
    %cst_110 = arith.constant dense<0.000000e+00> : vector<16x16xf32>
    %235 = tpu.matmul %232, %233, %cst_110 {dimension_numbers = #tpu.dot_dimension_numbers<[1], [1], [0], [0], [0, 0, 1, 0], [], []>} : vector<16x8xf32>, vector<16x8xf32>, vector<16x16xf32> -> vector<16x16xf32>
    "tpu.trace_stop"() : () -> ()
    %236 = arith.addf %235, %1 : vector<16x16xf32>
    %cst_111 = arith.constant dense<0xFF800000> : vector<16xf32>
    %237 = vector.multi_reduction <maximumf>, %236, %cst_111 [1] : vector<16x16xf32> to vector<16xf32>
    %238 = vector.shape_cast %237 : vector<16xf32> to vector<16x1xf32>
    %239 = vector.broadcast %238 : vector<16x1xf32> to vector<16x16xf32>
    %240 = arith.subf %236, %239 : vector<16x16xf32>
    %241 = math.exp %240 : vector<16x16xf32>
    %cst_112 = arith.constant dense<0.000000e+00> : vector<16xf32>
    %242 = vector.multi_reduction <add>, %241, %cst_112 [1] : vector<16x16xf32> to vector<16xf32>
    %243 = vector.shape_cast %242 : vector<16xf32> to vector<16x1xf32>
    %244 = tpu.reciprocal %243 {approx = true} : vector<16x1xf32> -> vector<16x1xf32>
    %245 = vector.broadcast %244 : vector<16x1xf32> to vector<16x16xf32>
    %246 = arith.mulf %241, %245 : vector<16x16xf32>
    %cst_113 = arith.constant dense<0.000000e+00> : vector<16x8xf32>
    %247 = tpu.matmul %246, %234, %cst_113 {dimension_numbers = #tpu.dot_dimension_numbers<[1], [0], [0], [1], [0, 0, 1, 1], [], []>} : vector<16x16xf32>, vector<16x8xf32>, vector<16x8xf32> -> vector<16x8xf32>
    %248 = vector.extract_strided_slice %199 {offsets = [0, 24], sizes = [16, 8], strides = [1, 1]} : vector<16x96xf32> to vector<16x8xf32>
    %249 = vector.extract_strided_slice %199 {offsets = [0, 56], sizes = [16, 8], strides = [1, 1]} : vector<16x96xf32> to vector<16x8xf32>
    %250 = vector.extract_strided_slice %199 {offsets = [0, 88], sizes = [16, 8], strides = [1, 1]} : vector<16x96xf32> to vector<16x8xf32>
    "tpu.trace_start"() <{level = 10 : i32, message = "qd,kd->qk"}> : () -> ()
    %cst_114 = arith.constant dense<0.000000e+00> : vector<16x16xf32>
    %251 = tpu.matmul %248, %249, %cst_114 {dimension_numbers = #tpu.dot_dimension_numbers<[1], [1], [0], [0], [0, 0, 1, 0], [], []>} : vector<16x8xf32>, vector<16x8xf32>, vector<16x16xf32> -> vector<16x16xf32>
    "tpu.trace_stop"() : () -> ()
    %252 = arith.addf %251, %1 : vector<16x16xf32>
    %cst_115 = arith.constant dense<0xFF800000> : vector<16xf32>
    %253 = vector.multi_reduction <maximumf>, %252, %cst_115 [1] : vector<16x16xf32> to vector<16xf32>
    %254 = vector.shape_cast %253 : vector<16xf32> to vector<16x1xf32>
    %255 = vector.broadcast %254 : vector<16x1xf32> to vector<16x16xf32>
    %256 = arith.subf %252, %255 : vector<16x16xf32>
    %257 = math.exp %256 : vector<16x16xf32>
    %cst_116 = arith.constant dense<0.000000e+00> : vector<16xf32>
    %258 = vector.multi_reduction <add>, %257, %cst_116 [1] : vector<16x16xf32> to vector<16xf32>
    %259 = vector.shape_cast %258 : vector<16xf32> to vector<16x1xf32>
    %260 = tpu.reciprocal %259 {approx = true} : vector<16x1xf32> -> vector<16x1xf32>
    %261 = vector.broadcast %260 : vector<16x1xf32> to vector<16x16xf32>
    %262 = arith.mulf %257, %261 : vector<16x16xf32>
    %cst_117 = arith.constant dense<0.000000e+00> : vector<16x8xf32>
    %263 = tpu.matmul %262, %250, %cst_117 {dimension_numbers = #tpu.dot_dimension_numbers<[1], [0], [0], [1], [0, 0, 1, 1], [], []>} : vector<16x16xf32>, vector<16x8xf32>, vector<16x8xf32> -> vector<16x8xf32>
    %264 = tpu.concatenate %215, %231, %247, %263 in 1 : vector<16x8xf32>, vector<16x8xf32>, vector<16x8xf32>, vector<16x8xf32> -> vector<16x32xf32>
    %cst_118 = arith.constant dense<0.000000e+00> : vector<16x32xf32>
    %265 = tpu.matmul %264, %154, %cst_118 {dimension_numbers = #tpu.dot_dimension_numbers<[1], [0], [0], [1], [0, 0, 1, 1], [], []>} : vector<16x32xf32>, vector<32x32xf32>, vector<16x32xf32> -> vector<16x32xf32>
    %266 = vector.broadcast %162 : vector<1x32xf32> to vector<16x32xf32>
    %267 = arith.addf %265, %266 : vector<16x32xf32>
    %268 = arith.addf %150, %267 : vector<16x32xf32>
    %cst_119 = arith.constant dense<0.000000e+00> : vector<16xf32>
    %269 = vector.multi_reduction <add>, %268, %cst_119 [1] : vector<16x32xf32> to vector<16xf32>
    %270 = vector.shape_cast %269 : vector<16xf32> to vector<16x1xf32>
    %cst_120 = arith.constant 3.200000e+01 : f32
    %271 = vector.broadcast %cst_120 : f32 to vector<16x1xf32>
    %272 = arith.divf %270, %271 : vector<16x1xf32>
    %273 = vector.broadcast %272 : vector<16x1xf32> to vector<16x32xf32>
    %274 = arith.subf %268, %273 : vector<16x32xf32>
    %275 = arith.mulf %274, %274 : vector<16x32xf32>
    %cst_121 = arith.constant dense<0.000000e+00> : vector<16xf32>
    %276 = vector.multi_reduction <add>, %275, %cst_121 [1] : vector<16x32xf32> to vector<16xf32>
    %277 = vector.shape_cast %276 : vector<16xf32> to vector<16x1xf32>
    %cst_122 = arith.constant 3.200000e+01 : f32
    %278 = vector.broadcast %cst_122 : f32 to vector<16x1xf32>
    %279 = arith.divf %277, %278 : vector<16x1xf32>
    %280 = vector.broadcast %272 : vector<16x1xf32> to vector<16x32xf32>
    %281 = arith.subf %268, %280 : vector<16x32xf32>
    %cst_123 = arith.constant 9.99999974E-6 : f32
    %282 = vector.broadcast %cst_123 : f32 to vector<16x1xf32>
    %283 = arith.addf %279, %282 : vector<16x1xf32>
    %284 = math.rsqrt %283 : vector<16x1xf32>
    %285 = vector.broadcast %284 : vector<16x1xf32> to vector<16x32xf32>
    %286 = arith.mulf %281, %285 : vector<16x32xf32>
    %287 = vector.broadcast %168 : vector<1x32xf32> to vector<16x32xf32>
    %288 = arith.mulf %286, %287 : vector<16x32xf32>
    %289 = vector.broadcast %170 : vector<1x32xf32> to vector<16x32xf32>
    %290 = arith.addf %288, %289 : vector<16x32xf32>
    %cst_124 = arith.constant dense<0.000000e+00> : vector<16x64xf32>
    %291 = tpu.matmul %290, %156, %cst_124 {dimension_numbers = #tpu.dot_dimension_numbers<[1], [0], [0], [1], [0, 0, 1, 1], [], []>} : vector<16x32xf32>, vector<32x64xf32>, vector<16x64xf32> -> vector<16x64xf32>
    %292 = vector.broadcast %172 : vector<1x64xf32> to vector<16x64xf32>
    %293 = arith.addf %291, %292 : vector<16x64xf32>
    %cst_125 = arith.constant 0.000000e+00 : f32
    %294 = vector.broadcast %cst_125 : f32 to vector<16x64xf32>
    %295 = arith.maximumf %293, %294 : vector<16x64xf32>
    %cst_126 = arith.constant dense<0.000000e+00> : vector<16x32xf32>
    %296 = tpu.matmul %295, %158, %cst_126 {dimension_numbers = #tpu.dot_dimension_numbers<[1], [0], [0], [1], [0, 0, 1, 1], [], []>} : vector<16x64xf32>, vector<64x32xf32>, vector<16x32xf32> -> vector<16x32xf32>
    %297 = vector.broadcast %174 : vector<1x32xf32> to vector<16x32xf32>
    %298 = arith.addf %296, %297 : vector<16x32xf32>
    %299 = arith.addf %268, %298 : vector<16x32xf32>
    %c2_127 = arith.constant 2 : index
    %c0_128 = arith.constant 0 : index
    %c0_129 = arith.constant 0 : index
    %300 = vector.load %arg4[%c2_127, %c0_128, %c0_129] : memref<3x8x96xf32, #tpu.memory_space<vmem>>, vector<1x1x32xf32>
    %301 = vector.shape_cast %300 : vector<1x1x32xf32> to vector<1x32xf32>
    %c2_130 = arith.constant 2 : index
    %c1_131 = arith.constant 1 : index
    %c0_132 = arith.constant 0 : index
    %302 = vector.load %arg4[%c2_130, %c1_131, %c0_132] : memref<3x8x96xf32, #tpu.memory_space<vmem>>, vector<1x1x32xf32>
    %303 = vector.shape_cast %302 : vector<1x1x32xf32> to vector<1x32xf32>
    %cst_133 = arith.constant dense<0.000000e+00> : vector<16xf32>
    %304 = vector.multi_reduction <add>, %299, %cst_133 [1] : vector<16x32xf32> to vector<16xf32>
    %305 = vector.shape_cast %304 : vector<16xf32> to vector<16x1xf32>
    %cst_134 = arith.constant 3.200000e+01 : f32
    %306 = vector.broadcast %cst_134 : f32 to vector<16x1xf32>
    %307 = arith.divf %305, %306 : vector<16x1xf32>
    %308 = vector.broadcast %307 : vector<16x1xf32> to vector<16x32xf32>
    %309 = arith.subf %299, %308 : vector<16x32xf32>
    %310 = arith.mulf %309, %309 : vector<16x32xf32>
    %cst_135 = arith.constant dense<0.000000e+00> : vector<16xf32>
    %311 = vector.multi_reduction <add>, %310, %cst_135 [1] : vector<16x32xf32> to vector<16xf32>
    %312 = vector.shape_cast %311 : vector<16xf32> to vector<16x1xf32>
    %cst_136 = arith.constant 3.200000e+01 : f32
    %313 = vector.broadcast %cst_136 : f32 to vector<16x1xf32>
    %314 = arith.divf %312, %313 : vector<16x1xf32>
    %315 = vector.broadcast %307 : vector<16x1xf32> to vector<16x32xf32>
    %316 = arith.subf %299, %315 : vector<16x32xf32>
    %cst_137 = arith.constant 9.99999974E-6 : f32
    %317 = vector.broadcast %cst_137 : f32 to vector<16x1xf32>
    %318 = arith.addf %314, %317 : vector<16x1xf32>
    %319 = math.rsqrt %318 : vector<16x1xf32>
    %320 = vector.broadcast %319 : vector<16x1xf32> to vector<16x32xf32>
    %321 = arith.mulf %316, %320 : vector<16x32xf32>
    %322 = vector.broadcast %301 : vector<1x32xf32> to vector<16x32xf32>
    %323 = arith.mulf %321, %322 : vector<16x32xf32>
    %324 = vector.broadcast %303 : vector<1x32xf32> to vector<16x32xf32>
    %325 = arith.addf %323, %324 : vector<16x32xf32>
    %c0_138 = arith.constant 0 : index
    %c0_139 = arith.constant 0 : index
    %326 = vector.load %arg5[%c0_138, %c0_139] : memref<16x32xf32, #tpu.memory_space<vmem>>, vector<16x32xf32>
    tpu.vector_store %arg5[%c0_138, %c0_139], %325 {strides = array<i32>} : memref<16x32xf32, #tpu.memory_space<vmem>>, vector<16x32xf32>,
    return
  }
}

</mosaic_0001>

<bundles_post_ra>
// kernel: transformer_encoder.1
= control target key start
LH: loop header
LB: loop body
LE: loop exit
PB: predicated region body
PF: predicated region fallthrough
CT: control target
= control target key end

     0   :  { %vm53_vm0 = vcmask 261120   ;;  %s4036_s0 = inlined_call_operand.vmem [shape: f32[16,32], index: 0, kind: input, shape index: {}]   ;;  %s4037_s1 = inlined_call_operand.vmem [shape: f32[16,16], index: 1, kind: input, shape index: {}]   ;;  %s4038_s2 = inlined_call_operand.vmem [shape: f32[2,32,384], index: 2, kind: input, shape index: {}]   ;;  %s4039_s3 = inlined_call_operand.vmem [shape: f32[2,64,32], index: 3, kind: input, shape index: {}]   ;;  %s4040_s4 = inlined_call_operand.vmem [shape: f32[3,8,96], index: 4, kind: input, shape index: {}]   ;;  %s4041_s5 = inlined_call_operand.hbm [shape: f32[16,32], index: 5, kind: output, shape index: {}]  }
   0x1   :  { %v3512_v0 = vld [vmem:[%s4036_s0] sm:$0xff]  ;;  %v3517_v1 = vld [vmem:[%s4036_s0 + $0x8] sm:$0xff] }
   0x2   :  { %10 = vsyncpa [#allocation3], 0  ;;  %v54_v2 = vsel %vm53_vm0, %v3512_v0, 0.0  ;;  %v57_v3 = vsel %vm53_vm0, %v3517_v1, 0.0  ;;  %v25_v14 = vld [vmem:[%s4038_s2] sm:$0xff]  ;;  %v26_v15 = vld [vmem:[%s4038_s2 + $0x18] sm:$0xff] }
   0x3   :  { %55 = vadd.xlane.f32.xlu0 %v54_v2  ;;  %v27_v16 = vld [vmem:[%s4038_s2 + $0x30] sm:$0xff]  ;;  %v3097_v17 = vpack.c.bf16 %v26_v15, %v25_v14  ;;  %v28_v18 = vld [vmem:[%s4038_s2 + $0x48] sm:$0xff]  ;;  %v2649_v27 = vld [vmem:[%s4040_s4 + $0x2] ss:$0 sm:$0xff]  ;;  %vm184_vm1 = vcmask 64512   ;;  %s3463_s10 = smov 88  }
   0x4   :  { %v3101_v19 = vpack.c.bf16 %v28_v18, %v27_v16  ;;  %v2650_v29 = vld [vmem:[%s4040_s4 + $0x3] ss:$0 sm:$0xff]  ;;  %v2651_v36 = vld [vmem:[%s4040_s4] ss:$0 sm:$0xff]  ;;  %s3464_s11 = smov 96   ;;  %s3465_s12 = smov 120   ;;  %vm3570_vm2 = vmpackc.low %vm184_vm1, %vm184_vm1 }
   0x5   :  { %3098 = vmatprep.subr.bf16.mxu1 %v3097_v17  ;;  %v3589_v53 = vld [vmem:[%s4037_s1 + $0x8] sm:$0xff]  ;;  %v3594_v54 = vld [vmem:[%s4037_s1] sm:$0xff]  ;;  %vm268_vm3 = vcmask 130048   ;;  %s3466_s17 = smov 56   ;;  %s3467_s18 = smov 64   ;;  %vm1006_vm4 = vcmask 195584  }
   0x6   :  { %3100 = vmatpush3.bf16.msra.mxu1 %v3097_v17  ;;  %s3468_s19 = smov 80   ;;  %s3469_s20 = smov 112   ;;  %vm1225_vm5 = vcmask 523264  }
   0x7   :  { %58 = vadd.xlane.f32.xlu0 %v57_v3  ;;  %3102 = vmatprep.subr.bf16.mxu1 %v3101_v19  ;;  %s3470_s21 = smov 48   ;;  %s3471_s0 = smov 104  }
   0x8   :  { %s3472_s22 = smov 72   ;;  %s3473_s23 = smov 40  }
   0x9   :  { %s3474_s24 = smov 8   ;;  %s3475_s25 = smov 16  }
   0xa   :  { %3104 = vmatpush3.bf16.msra.mxu1 %v3101_v19  ;;  %s3476_s9 = smov 24   ;;  %s3477_s30 = smov [#allocation2]  }
   0xb   :  { %s2638_s6 = sshll.u32 %s3477_s30, 4  ;;  %s2639_s6 = int_to_ptr.vmem [resolvable:$true] %s2638_s6 }
   0xc   :  { %s3439_s7 = scalar_lea.vmem %s2639_s6, 256  ;;  %p3444_p1 = scmp.lt.s32.totalorder %s2639_s6, %s2639_s6 }
   0xd   :  { %p3440_p0 = scmp.ne.s32.totalorder %s2639_s6, %s3439_s7  ;;  %p3445_p2 = scmp.lt.s32.totalorder %s3439_s7, %s3439_s7 }
   0xf   :  { %p3446_p3 = por %p3445_p2, %p3444_p1 }
  0x11   :  { %p3447_p4 = pnand %p3446_p3, %p3440_p0 }
  0x90   :  { %v56_v4 = vpop.xlane.xlu0 %55 }
  0x91   :  { %v61_v5 = vmul.f32 0.03125, %v56_v4 }
  0x93   :  { %v63_v6 = vsub.f32 %v3512_v0, %v61_v5 }
  0x94   :  { %v59_v7 = vpop.xlane.xlu0 %58 }
  0x95   :  { %v62_v8 = vmul.f32 0.03125, %v59_v7  ;;  %v65_v9 = vmul.f32 %v63_v6, %v63_v6 }
  0x97   :  { %v64_v10 = vsub.f32 %v3517_v1, %v62_v8  ;;  %v67_v11 = vsel %vm53_vm0, %v65_v9, 0.0 }
  0x98   :  { %68 = vadd.xlane.f32.xlu1 %v67_v11 }
  0x99   :  { %v66_v12 = vmul.f32 %v64_v10, %v64_v10 }
  0x9b   :  { %v70_v13 = vsel %vm53_vm0, %v66_v12, 0.0 }
  0x9c   :  { %71 = vadd.xlane.f32.xlu1 %v70_v13 }
 0x125   :  { %v69_v20 = vpop.xlane.xlu1 %68 }
 0x126   :  { %v73_v21 = vmul.f32 0.03125, %v69_v20 }
 0x128   :  { %v75_v22 = vadd.f32 1e-05, %v73_v21 }
 0x129   :  { %v72_v23 = vpop.xlane.xlu1 %71 }
 0x12a   :  { %3353 = vrsqrt.f32 %v75_v22  ;;  %v74_v24 = vmul.f32 0.03125, %v72_v23 }
 0x12c   :  { %v76_v25 = vadd.f32 1e-05, %v74_v24 }
 0x12e   :  { %3355 = vrsqrt.f32 %v76_v25 }
 0x134   :  { %v3354_v26 = vpop.eup %3353 }
 0x135   :  { %v79_v28 = vmul.f32 %v3354_v26, %v63_v6 }
 0x137   :  { %v85_v30 = vmul.f32 %v2649_v27, %v79_v28 }
 0x138   :  { %v3356_v31 = vpop.eup %3355 }
 0x139   :  { %v80_v32 = vmul.f32 %v3356_v31, %v64_v10  ;;  %v91_v33 = vadd.f32 %v2650_v29, %v85_v30 }
 0x13b   :  { %v86_v34 = vmul.f32 %v2649_v27, %v80_v32  ;;  %2889 = vmatprep.mubr.msk.f32.mxu1 %vm53_vm0, %v91_v33 }
 0x13d   :  { %v92_v35 = vadd.f32 %v2650_v29, %v86_v34 }
 0x13f   :  { %2890 = vmatmul.mubr.msk.f32.vlgmr.msra.gmra.mrb[0].mxu1 %vm53_vm0, %v92_v35 }
 0x212   :  { %v2891_v37 = vpop.f32.mrb[0].mxu1 }
 0x213   :  { %v3550_v38 = vadd.f32 %v2891_v37, %v2651_v36  ;;  %v169_v39 = vpop.f32.mrb[1].mxu1 }
 0x214   :  { %v3552_v40 = vadd.f32 %v2651_v36, %v169_v39 }
 0x216   :  { %2896 = vmatprep.mubr.msk.f32.mxu1 %vm184_vm1, %v3552_v40  ;;  %v3558_v41 = vpack.i.bf16 %v3550_v38, %v3552_v40 }
 0x218   :  { %3279 = vrot.lane.b32.xlu1 %v3558_v41, %s3463_s10  ;;  %3274 = vrot.lane.b32.xlu0 %v3558_v41, %s3464_s11 }
 0x21c   :  { %378 = vrot.lane.b32.xlu1 %v3552_v40, %s3465_s12 }
 0x220   :  { %380 = vrot.lane.b32.xlu1 %v3550_v38, %s3465_s12 }
 0x28a   :  { %v3280_v42 = vpop.permute.xlu1 %3279  ;;  %v3275_v43 = vpop.permute.xlu0 %3274 }
 0x28b   :  { %v3282_v44 = vunpack.i.h.bf16 %v3280_v42  ;;  %v3281_v45 = vunpack.i.l.bf16 %v3280_v42  ;;  %v3277_v46 = vunpack.i.h.bf16 %v3275_v43  ;;  %v3276_v47 = vunpack.i.l.bf16 %v3275_v43 }
 0x28d   :  { %v3105_v49 = vpack.c.bf16 %v3277_v46, %v3276_v47  ;;  %v3115_v50 = vpack.c.bf16 %v3282_v44, %v3281_v45 }
 0x28e   :  { %v379_v51 = vpop.permute.xlu1 %378 }
 0x28f   :  { %3107 = vmatprep.subr.msk.bf16.mxu1 %vm3570_vm2, %v3105_v49 }
 0x290   :  { %3110 = vmatpush3.bf16.xpose.msk.msra.mxu1 %vm3570_vm2, %v3105_v49 }
 0x291   :  { %3117 = vmatprep.subr.msk.bf16.mxu1 %vm3570_vm2, %v3115_v50 }
 0x292   :  { %v381_v52 = vpop.permute.xlu1 %380 }
 0x297   :  { %2897 = vmatmul.mubr.msk.f32.vlgmr.msra.gmra.mrb[2].mxu1 %vm184_vm1, %v3550_v38 }
 0x298   :  { %3120 = vmatpush3.bf16.xpose.msk.msra.mxu1 %vm3570_vm2, %v3115_v50  ;;  %2910 = vmatprep.mubr.msk.f32.mxu1 %vm184_vm1, %v379_v51 }
 0x29f   :  { %2911 = vmatmul.mubr.msk.f32.vlgmr.msra.gmra.mrb[4].mxu1 %vm184_vm1, %v381_v52 }
 0x36a   :  { %v2898_v55 = vpop.f32.mrb[2].mxu1 }
 0x36b   :  { %v265_v56 = vadd.f32 %v2898_v55, %v3589_v53  ;;  %v259_v57 = vpop.f32.mrb[3].mxu1 }
 0x36c   :  { %v260_v58 = vadd.f32 %v259_v57, %v3594_v54 }
 0x36d   :  { %v272_v59 = vsel %vm268_vm3, %v265_v56, -inf }
 0x36e   :  { %273 = vmax.xlane.f32.xlu1 %v272_v59  ;;  %v269_v60 = vsel %vm268_vm3, %v260_v58, -inf }
 0x36f   :  { %270 = vmax.xlane.f32.xlu0 %v269_v60 }
 0x372   :  { %v2912_v61 = vpop.f32.mrb[4].mxu1 }
 0x373   :  { %v460_v62 = vpop.f32.mrb[5].mxu1  ;;  %v466_v2 = vadd.f32 %v2912_v61, %v3589_v53 }
 0x374   :  { %v461_v63 = vadd.f32 %v460_v62, %v3594_v54 }
 0x375   :  { %v472_v4 = vsel %vm268_vm3, %v466_v2, -inf }
 0x376   :  { %v469_v3 = vsel %vm268_vm3, %v461_v63, -inf }
 0x377   :  { %470 = vmax.xlane.f32.xlu0 %v469_v3 }
 0x37b   :  { %473 = vmax.xlane.f32.xlu0 %v472_v4 }
 0x3fb   :  { %v274_v5 = vpop.xlane.xlu1 %273 }
 0x3fc   :  { %v276_v6 = vsub.f32 %v265_v56, %v274_v5  ;;  %v271_v7 = vpop.xlane.xlu0 %270 }
 0x3fd   :  { %v275_v8 = vsub.f32 %v260_v58, %v271_v7 }
 0x3fe   :  { %v279_v9 = vmul.f32 1.442695, %v276_v6 }
 0x3ff   :  { %v277_v10 = vmul.f32 1.442695, %v275_v8 }
 0x400   :  { %3357 = vpow2.f32 %v279_v9 }
 0x401   :  { %3359 = vpow2.f32 %v277_v10 }
 0x404   :  { %v471_v11 = vpop.xlane.xlu0 %470 }
 0x405   :  { %v475_v12 = vsub.f32 %v461_v63, %v471_v11 }
 0x407   :  { %v477_v13 = vmul.f32 1.442695, %v475_v12 }
 0x408   :  { %v474_v14 = vpop.xlane.xlu0 %473 }
 0x409   :  { %3361 = vpow2.f32 %v477_v13  ;;  %v476_v15 = vsub.f32 %v466_v2, %v474_v14 }
 0x40a   :  { %v3358_v16 = vpop.eup %3357 }
 0x40b   :  { %v3360_v17 = vpop.eup %3359  ;;  %v479_v18 = vmul.f32 1.442695, %v476_v15  ;;  %v284_v19 = vsel %vm268_vm3, %v3358_v16, 0.0 }
 0x40c   :  { %285 = vadd.xlane.f32.xlu1 %v284_v19  ;;  %v281_v20 = vsel %vm268_vm3, %v3360_v17, 0.0 }
 0x40d   :  { %3363 = vpow2.f32 %v479_v18  ;;  %282 = vadd.xlane.f32.xlu0 %v281_v20 }
 0x413   :  { %v3362_v21 = vpop.eup %3361 }
 0x414   :  { %v481_v22 = vsel %vm268_vm3, %v3362_v21, 0.0 }
 0x415   :  { %482 = vadd.xlane.f32.xlu0 %v481_v22 }
 0x417   :  { %v3364_v23 = vpop.eup %3363 }
 0x418   :  { %v484_v24 = vsel %vm268_vm3, %v3364_v23, 0.0 }
 0x419   :  { %485 = vadd.xlane.f32.xlu1 %v484_v24 }
 0x42a   :  { %3289 = vrot.lane.b32.xlu1 %v3558_v41, %s3466_s17 }
 0x42b   :  { %3284 = vrot.lane.b32.xlu0 %v3558_v41, %s3467_s18 }
 0x42e   :  { %3294 = vrot.lane.b32.xlu1 %v3558_v41, %s3468_s19 }
 0x42f   :  { %580 = vrot.lane.b32.xlu0 %v3550_v38, %s3469_s20 }
 0x432   :  { %578 = vrot.lane.b32.xlu1 %v3552_v40, %s3469_s20 }
 0x499   :  { %v286_v26 = vpop.xlane.xlu1 %285 }
 0x49a   :  { %v283_v25 = vpop.xlane.xlu0 %282 }
 0x49b   :  { %3365 = vrcp.f32 %v283_v25 }
 0x49c   :  { %3367 = vrcp.f32 %v286_v26 }
 0x4a2   :  { %v483_v27 = vpop.xlane.xlu0 %482 }
 0x4a3   :  { %3369 = vrcp.f32 %v483_v27 }
 0x4a5   :  { %v3366_v28 = vpop.eup %3365 }
 0x4a6   :  { %v486_v29 = vpop.xlane.xlu1 %485  ;;  %v3285_v30 = vpop.permute.xlu0 %3284  ;;  %v289_v31 = vmul.f32 %v3366_v28, %v3360_v17 }
 0x4a7   :  { %3371 = vrcp.f32 %v486_v29  ;;  %v3287_v32 = vunpack.i.h.bf16 %v3285_v30  ;;  %v3286_v33 = vunpack.i.l.bf16 %v3285_v30  ;;  %v3368_v35 = vpop.eup %3367 }
 0x4a8   :  { %2903 = vmatprep.mubr.msk.f32.mxu0 %vm268_vm3, %v289_v31  ;;  %v290_v44 = vmul.f32 %v3368_v35, %v3358_v16 }
 0x4a9   :  { %v3111_v34 = vpack.c.bf16 %v3287_v32, %v3286_v33 }
 0x4aa   :  { %v3290_v36 = vpop.permute.xlu1 %3289  ;;  %v581_v56 = vpop.permute.xlu0 %580 }
 0x4ab   :  { %v3292_v37 = vunpack.i.h.bf16 %v3290_v36  ;;  %v3291_v39 = vunpack.i.l.bf16 %v3290_v36  ;;  %3112 = vmatprep.subr.bf16.mxu0 %v3111_v34 }
 0x4ac   :  { %3114 = vmatpush3.bf16.msra.mxu0 %v3111_v34 }
 0x4ad   :  { %v3370_v42 = vpop.eup %3369  ;;  %v3121_v43 = vpack.c.bf16 %v3292_v37, %v3291_v39 }
 0x4ae   :  { %v3295_v45 = vpop.permute.xlu1 %3294  ;;  %v489_v46 = vmul.f32 %v3370_v42, %v3362_v21 }
 0x4af   :  { %v3297_v47 = vunpack.i.h.bf16 %v3295_v45  ;;  %v3296_v49 = vunpack.i.l.bf16 %v3295_v45  ;;  %2904 = vmatmul.mubr.msk.f32.vlgmr.msra.gmra.mrb[0].mxu0 %vm268_vm3, %v290_v44  ;;  %3122 = vmatprep.subr.bf16.mxu0 %v3121_v43 }
 0x4b0   :  { %3124 = vmatpush3.bf16.msra.mxu0 %v3121_v43  ;;  %2917 = vmatprep.mubr.msk.f32.mxu0 %vm268_vm3, %v489_v46 }
 0x4b1   :  { %v3372_v50 = vpop.eup %3371  ;;  %v3125_v51 = vpack.c.bf16 %v3297_v47, %v3296_v49 }
 0x4b2   :  { %v490_v52 = vmul.f32 %v3372_v50, %v3364_v23  ;;  %v579_v55 = vpop.permute.xlu1 %578 }
 0x4b3   :  { %3127 = vmatprep.subr.msk.bf16.mxu0 %vm3570_vm2, %v3125_v51 }
 0x4b4   :  { %2918 = vmatmul.mubr.msk.f32.vlgmr.msra.gmra.mrb[2].mxu0 %vm268_vm3, %v490_v52 }
 0x4b5   :  { %2924 = vmatprep.mubr.msk.f32.mxu0 %vm184_vm1, %v579_v55 }
 0x4b9   :  { %3130 = vmatpush3.bf16.xpose.msk.msra.mxu0 %vm3570_vm2, %v3125_v51 }
 0x4c0   :  { %2925 = vmatmul.mubr.msk.f32.vlgmr.msra.gmra.mrb[4].mxu0 %vm184_vm1, %v581_v56 }
 0x582   :  { %v3628_v57 = vpop.f32.mrb[0].mxu0 }
 0x583   :  { %v3630_v58 = vpop.f32.mrb[1].mxu0 }
 0x587   :  { %v3632_v59 = vpop.f32.mrb[2].mxu0 }
 0x588   :  { %v3634_v60 = vpop.f32.mrb[3].mxu0 }
 0x593   :  { %v2926_v61 = vpop.f32.mrb[4].mxu0 }
 0x594   :  { %v666_v62 = vadd.f32 %v2926_v61, %v3589_v53  ;;  %v660_v63 = vpop.f32.mrb[5].mxu0 }
 0x595   :  { %v661_v2 = vadd.f32 %v660_v63, %v3594_v54 }
 0x596   :  { %v672_v3 = vsel %vm268_vm3, %v666_v62, -inf }
 0x597   :  { %673 = vmax.xlane.f32.xlu0 %v672_v3  ;;  %v669_v4 = vsel %vm268_vm3, %v661_v2, -inf  ;;  %v29_v3 = vld [vmem:[%s4038_s2 + $0x8] sm:$0xff] }
 0x598   :  { %670 = vmax.xlane.f32.xlu1 %v669_v4  ;;  %v31_v4 = vld [vmem:[%s4038_s2 + $0x38] sm:$0xff] }
 0x5a9   :  { %3299 = vrot.lane.b32.xlu1 %v3558_v41, %s3470_s21 }
 0x5ad   :  { %778 = vrot.lane.b32.xlu1 %v3552_v40, %s3471_s0 }
 0x5b1   :  { %780 = vrot.lane.b32.xlu1 %v3550_v38, %s3471_s0 }
 0x624   :  { %v674_v5 = vpop.xlane.xlu0 %673 }
 0x625   :  { %v676_v6 = vsub.f32 %v666_v62, %v674_v5  ;;  %v671_v7 = vpop.xlane.xlu1 %670 }
 0x626   :  { %v675_v8 = vsub.f32 %v661_v2, %v671_v7 }
 0x627   :  { %v679_v9 = vmul.f32 1.442695, %v676_v6  ;;  %v32_v6 = vld [vmem:[%s4038_s2 + $0x50] sm:$0xff] }
 0x628   :  { %v677_v10 = vmul.f32 1.442695, %v675_v8  ;;  %v3149_v7 = vpack.c.bf16 %v32_v6, %v31_v4  ;;  %v2682_v4 = vld [vmem:[%s4040_s4 + $0x5] ss:$0 sm:$0xff] }
 0x629   :  { %3373 = vpow2.f32 %v679_v9  ;;  %v3300_v11 = vpop.permute.xlu1 %3299 }
 0x62a   :  { %v3302_v12 = vunpack.i.h.bf16 %v3300_v11  ;;  %v3301_v13 = vunpack.i.l.bf16 %v3300_v11  ;;  %3375 = vpow2.f32 %v677_v10 }
 0x62c   :  { %v3131_v14 = vpack.c.bf16 %v3302_v12, %v3301_v13 }
 0x62d   :  { %v779_v27 = vpop.permute.xlu1 %778 }
 0x62e   :  { %3132 = vmatprep.subr.bf16.mxu1 %v3131_v14 }
 0x62f   :  { %3134 = vmatpush3.bf16.msra.mxu1 %v3131_v14 }
 0x631   :  { %v781_v28 = vpop.permute.xlu1 %780 }
 0x633   :  { %v3374_v15 = vpop.eup %3373 }
 0x634   :  { %v684_v40 = vsel %vm268_vm3, %v3374_v15, 0.0  ;;  %v3376_v16 = vpop.eup %3375 }
 0x635   :  { %685 = vadd.xlane.f32.xlu0 %v684_v40  ;;  %v681_v38 = vsel %vm268_vm3, %v3376_v16, 0.0 }
 0x639   :  { %682 = vadd.xlane.f32.xlu0 %v681_v38 }
 0x64f   :  { %3304 = vrot.lane.b32.xlu0 %v3558_v41, %s3472_s22 }
 0x6c2   :  { %v686_v17 = vpop.xlane.xlu0 %685 }
 0x6c3   :  { %3377 = vrcp.f32 %v686_v17 }
 0x6c6   :  { %v683_v18 = vpop.xlane.xlu0 %682 }
 0x6c7   :  { %3379 = vrcp.f32 %v683_v18 }
 0x6ca   :  { %v3305_v19 = vpop.permute.xlu0 %3304 }
 0x6cb   :  { %v3307_v20 = vunpack.i.h.bf16 %v3305_v19  ;;  %v3306_v21 = vunpack.i.l.bf16 %v3305_v19 }
 0x6cd   :  { %v3135_v22 = vpack.c.bf16 %v3307_v20, %v3306_v21  ;;  %v3378_v23 = vpop.eup %3377 }
 0x6ce   :  { %v690_v26 = vmul.f32 %v3378_v23, %v3374_v15 }
 0x6cf   :  { %3137 = vmatprep.subr.msk.bf16.mxu1 %vm3570_vm2, %v3135_v22 }
 0x6d1   :  { %v3380_v24 = vpop.eup %3379 }
 0x6d2   :  { %v689_v25 = vmul.f32 %v3380_v24, %v3376_v16 }
 0x6d4   :  { %2931 = vmatprep.mubr.msk.f32.mxu1 %vm268_vm3, %v689_v25 }
 0x6d5   :  { %2932 = vmatmul.mubr.msk.f32.vlgmr.msra.gmra.mrb[6].mxu1 %vm268_vm3, %v690_v26 }
 0x6d6   :  { %3140 = vmatpush3.bf16.xpose.msk.msra.mxu1 %vm3570_vm2, %v3135_v22  ;;  %2938 = vmatprep.mubr.msk.f32.mxu1 %vm184_vm1, %v779_v27 }
 0x6dd   :  { %2939 = vmatmul.mubr.msk.f32.vlgmr.msra.gmra.mrb[8].mxu1 %vm184_vm1, %v781_v28 }
 0x7a8   :  { %v2933_v29 = vpop.f32.mrb[6].mxu1 }
 0x7a9   :  { %v769_v30 = vpop.f32.mrb[7].mxu1 }
 0x7b0   :  { %v2940_v31 = vpop.f32.mrb[8].mxu1 }
 0x7b1   :  { %v866_v32 = vadd.f32 %v2940_v31, %v3589_v53  ;;  %v860_v33 = vpop.f32.mrb[9].mxu1 }
 0x7b2   :  { %v861_v34 = vadd.f32 %v860_v33, %v3594_v54 }
 0x7b3   :  { %v872_v35 = vsel %vm268_vm3, %v866_v32, -inf }
 0x7b4   :  { %873 = vmax.xlane.f32.xlu0 %v872_v35  ;;  %v869_v36 = vsel %vm268_vm3, %v861_v34, -inf  ;;  %v33_v35 = vld [vmem:[%s4038_s2 + $0x10] sm:$0xff] }
 0x7b5   :  { %870 = vmax.xlane.f32.xlu1 %v869_v36  ;;  %v34_v36 = vld [vmem:[%s4038_s2 + $0x28] sm:$0xff] }
 0x7c6   :  { %3309 = vrot.lane.b32.xlu1 %v3558_v41, %s3473_s23 }
 0x7ca   :  { %982 = vrot.lane.b32.xlu1 %v3632_v59, %s3474_s24 }
 0x7ce   :  { %988 = vrot.lane.b32.xlu1 %v769_v30, %s3475_s25 }
 0x7d2   :  { %990 = vrot.lane.b32.xlu1 %v2933_v29, %s3475_s25 }
 0x841   :  { %v874_v37 = vpop.xlane.xlu0 %873 }
 0x842   :  { %v876_v39 = vsub.f32 %v866_v32, %v874_v37  ;;  %v871_v42 = vpop.xlane.xlu1 %870  ;;  %v3153_v37 = vpack.c.bf16 %v34_v36, %v33_v35  ;;  %v2690_v35 = vld [vmem:[%s4038_s2 + $0x78] sm:$0xff] }
 0x843   :  { %v875_v43 = vsub.f32 %v861_v34, %v871_v42  ;;  %v36_v42 = vld [vmem:[%s4038_s2 + $0x58] sm:$0xff] }
 0x844   :  { %v879_v44 = vmul.f32 1.442695, %v876_v39  ;;  %3154 = vmatprep.subr.bf16.mxu1 %v3153_v37  ;;  %v35_v39 = vld [vmem:[%s4038_s2 + $0x40] sm:$0xff] }
 0x845   :  { %v877_v45 = vmul.f32 1.442695, %v875_v43  ;;  %3156 = vmatpush3.bf16.msra.mxu1 %v3153_v37  ;;  %v3157_v43 = vpack.c.bf16 %v36_v42, %v35_v39  ;;  %v2691_v37 = vld [vmem:[%s4038_s2 + $0x90] sm:$0xff]  ;;  %v2692_v39 = vld [vmem:[%s4038_s2 + $0xa8] sm:$0xff] }
 0x846   :  { %v3310_v46 = vpop.permute.xlu1 %3309  ;;  %v3181_v42 = vpack.c.bf16 %v2692_v39, %v2691_v37 }
 0x847   :  { %3381 = vpow2.f32 %v877_v45  ;;  %v3312_v47 = vunpack.i.h.bf16 %v3310_v46  ;;  %v3311_v49 = vunpack.i.l.bf16 %v3310_v46  ;;  %3158 = vmatprep.subr.bf16.mxu1 %v3157_v43  ;;  %v38_v45 = vld [vmem:[%s4039_s3 + $0x8] sm:$0xff]  ;;  %v39_v46 = vld [vmem:[%s4039_s3 + $0x10] sm:$0xff] }
 0x848   :  { %3383 = vpow2.f32 %v879_v44  ;;  %v37_v44 = vld [vmem:[%s4039_s3] sm:$0xff] }
 0x849   :  { %v3141_v41 = vpack.c.bf16 %v3312_v47, %v3311_v49  ;;  %3160 = vmatpush3.bf16.msra.mxu1 %v3157_v43  ;;  %v3161_v47 = vpack.c.bf16 %v38_v45, %v37_v44  ;;  %v40_v49 = vld [vmem:[%s4039_s3 + $0x18] sm:$0xff] }
 0x84a   :  { %v983_v10 = vpop.permute.xlu1 %982 }
 0x84b   :  { %3142 = vmatprep.subr.bf16.mxu0 %v3141_v41  ;;  %v1003_v40 = vsel %vm184_vm1, %v3628_v57, %v983_v10 }
 0x84c   :  { %3144 = vmatpush3.bf16.msra.mxu0 %v3141_v41  ;;  %v3165_v41 = vpack.c.bf16 %v40_v49, %v39_v46 }
 0x84e   :  { %v989_v11 = vpop.permute.xlu1 %988 }
 0x851   :  { %v3382_v50 = vpop.eup %3381 }
 0x852   :  { %v881_v51 = vsel %vm268_vm3, %v3382_v50, 0.0  ;;  %v3384_v52 = vpop.eup %3383  ;;  %v991_v13 = vpop.permute.xlu1 %990 }
 0x853   :  { %882 = vadd.xlane.f32.xlu0 %v881_v51  ;;  %v884_v55 = vsel %vm268_vm3, %v3384_v52, 0.0  ;;  %v1005_v17 = vsel %vm268_vm3, %v1003_v40, %v991_v13  ;;  %v42_v51 = vld [vmem:[%s4039_s3 + $0x28] sm:$0xff] }
 0x857   :  { %885 = vadd.xlane.f32.xlu0 %v884_v55 }
 0x86d   :  { %980 = vrot.lane.b32.xlu0 %v3634_v60, %s3474_s24  ;;  %v30_v60 = vld [vmem:[%s4038_s2 + $0x20] sm:$0xff] }
 0x86e   :  { %v3145_v5 = vpack.c.bf16 %v30_v60, %v29_v3  ;;  %v2681_v3 = vld [vmem:[%s4040_s4 + $0x4] ss:$0 sm:$0xff] }
 0x870   :  { %3146 = vmatprep.subr.bf16.mxu0 %v3145_v5 }
 0x8e0   :  { %v883_v56 = vpop.xlane.xlu0 %882 }
 0x8e1   :  { %3385 = vrcp.f32 %v883_v56 }
 0x8e4   :  { %v886_v59 = vpop.xlane.xlu0 %885 }
 0x8e5   :  { %3387 = vrcp.f32 %v886_v59 }
 0x8e8   :  { %v981_v12 = vpop.permute.xlu0 %980 }
 0x8e9   :  { %v1002_v14 = vsel %vm184_vm1, %v3630_v58, %v981_v12  ;;  %v2678_v58 = vld [vmem:[%s4040_s4 + $0x1] ss:$0 sm:$0xff]  ;;  %v44_v12 = vld [vmem:[%s4039_s3 + $0x38] sm:$0xff] }
 0x8ea   :  { %v1004_v16 = vsel %vm268_vm3, %v1002_v14, %v989_v11  ;;  %v43_v11 = vld [vmem:[%s4039_s3 + $0x30] sm:$0xff]  ;;  %v2683_v14 = vld [vmem:[%s4040_s4 + $0x6] ss:$0 sm:$0xff] }
 0x8eb   :  { %v3386_v61 = vpop.eup %3385  ;;  %v3173_v13 = vpack.c.bf16 %v44_v12, %v43_v11 }
 0x8ec   :  { %v889_v62 = vmul.f32 %v3386_v61, %v3382_v50  ;;  %v41_v50 = vld [vmem:[%s4039_s3 + $0x20] sm:$0xff] }
 0x8ee   :  { %2945 = vmatprep.mubr.msk.f32.mxu0 %vm268_vm3, %v889_v62 }
 0x8ef   :  { %v3388_v63 = vpop.eup %3387 }
 0x8f0   :  { %v890_v2 = vmul.f32 %v3388_v63, %v3384_v52  ;;  %v3169_v52 = vpack.c.bf16 %v42_v51, %v41_v50  ;;  %v2717_v50 = vld [vmem:[%s4040_s4 + $0xa] ss:$0 sm:$0xff] }
 0x8f2   :  { %2946 = vmatmul.mubr.msk.f32.vlgmr.msra.gmra.mrb[6].mxu0 %vm268_vm3, %v890_v2 }
 0x8f3   :  { %3148 = vmatpush3.bf16.msra.mxu0 %v3145_v5 }
 0x8f4   :  { %3150 = vmatprep.subr.bf16.mxu0 %v3149_v7 }
 0x8f7   :  { %3152 = vmatpush3.bf16.msra.mxu0 %v3149_v7 }
 0x8f8   :  { %3162 = vmatprep.subr.bf16.mxu0 %v3161_v47 }
 0x9c5   :  { %v2947_v8 = vpop.f32.mrb[6].mxu0 }
 0x9c6   :  { %998 = vrot.lane.b32.xlu1 %v2947_v8, %s3476_s9  ;;  %v969_v9 = vpop.f32.mrb[7].mxu0 }
 0x9c7   :  { %996 = vrot.lane.b32.xlu0 %v969_v9, %s3476_s9 }
 0xa38   :  { %v999_v15 = vpop.permute.xlu1 %998 }
 0xa39   :  { %v997_v38 = vpop.permute.xlu0 %996  ;;  %v1008_v19 = vsel %vm1006_vm4, %v1005_v17, %v999_v15 }
 0xa3a   :  { %v1007_v18 = vsel %vm1006_vm4, %v1004_v16, %v997_v38 }
 0xa3b   :  { %2956 = vmatprep.mubr.msk.f32.mxu0 %vm53_vm0, %v1007_v18 }
 0xa3c   :  { %2957 = vmatmul.mubr.msk.f32.vlgmr.msra.gmra.mrb[8].mxu0 %vm53_vm0, %v1008_v19  ;;  %v2686_v19 = vld [vmem:[%s4040_s4 + $0x7] ss:$0 sm:$0xff] }
 0xa3d   :  { %3164 = vmatpush3.bf16.msra.mxu0 %v3161_v47 }
 0xa3e   :  { %3166 = vmatprep.subr.bf16.mxu0 %v3165_v41 }
 0xa41   :  { %3168 = vmatpush3.bf16.msra.mxu0 %v3165_v41 }
 0xa42   :  { %3170 = vmatprep.subr.bf16.mxu0 %v3169_v52 }
 0xa45   :  { %3172 = vmatpush3.bf16.msra.mxu0 %v3169_v52 }
 0xa46   :  { %3174 = vmatprep.subr.bf16.mxu0 %v3173_v13 }
 0xa49   :  { %3176 = vmatpush3.bf16.msra.mxu0 %v3173_v13 }
 0xb0f   :  { %v2958_v20 = vpop.f32.mrb[8].mxu0 }
 0xb10   :  { %v1091_v21 = vadd.f32 %v2958_v20, %v2678_v58  ;;  %v1085_v57 = vpop.f32.mrb[9].mxu0 }
 0xb11   :  { %v1086_v22 = vadd.f32 %v2678_v58, %v1085_v57 }
 0xb12   :  { %v3702_v23 = vadd.f32 %v1091_v21, %v3517_v1 }
 0xb13   :  { %v3705_v24 = vadd.f32 %v1086_v22, %v3512_v0 }
 0xb14   :  { %v1099_v25 = vsel %vm53_vm0, %v3702_v23, 0.0 }
 0xb15   :  { %1100 = vadd.xlane.f32.xlu1 %v1099_v25  ;;  %v1096_v26 = vsel %vm53_vm0, %v3705_v24, 0.0 }
 0xb16   :  { %1097 = vadd.xlane.f32.xlu0 %v1096_v26 }
 0xba2   :  { %v1101_v27 = vpop.xlane.xlu1 %1100 }
 0xba3   :  { %v1103_v28 = vmul.f32 0.03125, %v1101_v27  ;;  %v1098_v29 = vpop.xlane.xlu0 %1097 }
 0xba4   :  { %v1102_v30 = vmul.f32 0.03125, %v1098_v29 }
 0xba5   :  { %v1105_v31 = vsub.f32 %v3702_v23, %v1103_v28 }
 0xba6   :  { %v1104_v1 = vsub.f32 %v3705_v24, %v1102_v30 }
 0xba7   :  { %v1107_v33 = vmul.f32 %v1105_v31, %v1105_v31 }
 0xba8   :  { %v1106_v32 = vmul.f32 %v1104_v1, %v1104_v1 }
 0xba9   :  { %v1111_v34 = vsel %vm53_vm0, %v1107_v33, 0.0 }
 0xbaa   :  { %v1108_v0 = vsel %vm53_vm0, %v1106_v32, 0.0 }
 0xbab   :  { %1109 = vadd.xlane.f32.xlu0 %v1108_v0 }
 0xbaf   :  { %1112 = vadd.xlane.f32.xlu0 %v1111_v34  ;;  %v2689_v34 = vld [vmem:[%s4038_s2 + $0x60] sm:$0xff] }
 0xbb0   :  { %v3177_v36 = vpack.c.bf16 %v2690_v35, %v2689_v34 }
 0xbb2   :  { %3178 = vmatprep.subr.bf16.mxu1 %v3177_v36 }
 0xc38   :  { %v1110_v55 = vpop.xlane.xlu0 %1109 }
 0xc39   :  { %v1114_v56 = vmul.f32 0.03125, %v1110_v55 }
 0xc3b   :  { %v1116_v59 = vadd.f32 1e-05, %v1114_v56  ;;  %v2718_v56 = vld [vmem:[%s4040_s4 + $0xb] ss:$0 sm:$0xff] }
 0xc3c   :  { %v1113_v61 = vpop.xlane.xlu0 %1112 }
 0xc3d   :  { %3389 = vrsqrt.f32 %v1116_v59  ;;  %v1115_v62 = vmul.f32 0.03125, %v1113_v61 }
 0xc3f   :  { %v1117_v63 = vadd.f32 1e-05, %v1115_v62 }
 0xc41   :  { %3391 = vrsqrt.f32 %v1117_v63 }
 0xc47   :  { %v3390_v2 = vpop.eup %3389 }
 0xc48   :  { %v1120_v60 = vmul.f32 %v3390_v2, %v1104_v1  ;;  %v2719_v2 = vld [vmem:[%s4040_s4 + $0x8] ss:$0 sm:$0xff] }
 0xc4a   :  { %v1126_v5 = vmul.f32 %v2681_v3, %v1120_v60 }
 0xc4b   :  { %v3392_v6 = vpop.eup %3391 }
 0xc4c   :  { %v1121_v7 = vmul.f32 %v3392_v6, %v1105_v31  ;;  %v1132_v8 = vadd.f32 %v2682_v4, %v1126_v5 }
 0xc4e   :  { %v1127_v9 = vmul.f32 %v2681_v3, %v1121_v7  ;;  %2967 = vmatprep.mubr.msk.f32.mxu1 %vm53_vm0, %v1132_v8 }
 0xc50   :  { %v1133_v10 = vadd.f32 %v2682_v4, %v1127_v9 }
 0xc52   :  { %2968 = vmatmul.mubr.msk.f32.vlgmr.msra.gmra.mrb[10].mxu1 %vm53_vm0, %v1133_v10 }
 0xc53   :  { %3180 = vmatpush3.bf16.msra.mxu1 %v3177_v36 }
 0xc54   :  { %3182 = vmatprep.subr.bf16.mxu1 %v3181_v42 }
 0xc57   :  { %3184 = vmatpush3.bf16.msra.mxu1 %v3181_v42 }
 0xd25   :  { %v2969_v15 = vpop.f32.mrb[10].mxu1 }
 0xd26   :  { %v1216_v40 = vadd.f32 %v2969_v15, %v2683_v14  ;;  %v1210_v16 = vpop.f32.mrb[11].mxu1 }
 0xd27   :  { %v1211_v38 = vadd.f32 %v2683_v14, %v1210_v16 }
 0xd28   :  { %v1220_v18 = vmax.f32 %v1216_v40, 0.0 }
 0xd29   :  { %v1219_v17 = vmax.f32 %v1211_v38, 0.0 }
 0xd2b   :  { %2986 = vmatprep.mubr.msk.f32.mxu0 %vm1225_vm5, %v1219_v17 }
 0xd2c   :  { %2987 = vmatmul.mubr.msk.f32.vlgmr.msra.gmra.mrb[10].mxu0 %vm1225_vm5, %v1220_v18 }
 0xdff   :  { %v2988_v58 = vpop.f32.mrb[10].mxu0 }
 0xe00   :  { %v1304_v20 = vadd.f32 %v2988_v58, %v2686_v19  ;;  %v1298_v21 = vpop.f32.mrb[11].mxu0 }
 0xe01   :  { %v1299_v57 = vadd.f32 %v2686_v19, %v1298_v21 }
 0xe02   :  { %v3768_v22 = vadd.f32 %v1304_v20, %v3702_v23 }
 0xe03   :  { %v3771_v25 = vadd.f32 %v1299_v57, %v3705_v24 }
 0xe04   :  { %v1343_v26 = vsel %vm53_vm0, %v3768_v22, 0.0 }
 0xe05   :  { %1344 = vadd.xlane.f32.xlu1 %v1343_v26  ;;  %v1340_v27 = vsel %vm53_vm0, %v3771_v25, 0.0 }
 0xe06   :  { %1341 = vadd.xlane.f32.xlu0 %v1340_v27 }
 0xe92   :  { %v1345_v28 = vpop.xlane.xlu1 %1344 }
 0xe93   :  { %v1347_v29 = vmul.f32 0.03125, %v1345_v28  ;;  %v1342_v30 = vpop.xlane.xlu0 %1341 }
 0xe94   :  { %v1346_v31 = vmul.f32 0.03125, %v1342_v30 }
 0xe95   :  { %v1349_v1 = vsub.f32 %v3768_v22, %v1347_v29 }
 0xe96   :  { %v1348_v23 = vsub.f32 %v3771_v25, %v1346_v31 }
 0xe97   :  { %v1351_v32 = vmul.f32 %v1349_v1, %v1349_v1 }
 0xe98   :  { %v1350_v0 = vmul.f32 %v1348_v23, %v1348_v23 }
 0xe99   :  { %v1355_v24 = vsel %vm53_vm0, %v1351_v32, 0.0 }
 0xe9a   :  { %1356 = vadd.xlane.f32.xlu1 %v1355_v24  ;;  %v1352_v33 = vsel %vm53_vm0, %v1350_v0, 0.0 }
 0xe9b   :  { %1353 = vadd.xlane.f32.xlu0 %v1352_v33 }
 0xf27   :  { %v1357_v43 = vpop.xlane.xlu1 %1356 }
 0xf28   :  { %v1359_v44 = vmul.f32 0.03125, %v1357_v43  ;;  %v1354_v45 = vpop.xlane.xlu0 %1353 }
 0xf29   :  { %v1358_v46 = vmul.f32 0.03125, %v1354_v45 }
 0xf2a   :  { %v1361_v47 = vadd.f32 1e-05, %v1359_v44 }
 0xf2b   :  { %v1360_v49 = vadd.f32 1e-05, %v1358_v46 }
 0xf2c   :  { %3393 = vrsqrt.f32 %v1361_v47 }
 0xf2d   :  { %3395 = vrsqrt.f32 %v1360_v49 }
 0xf36   :  { %v3394_v41 = vpop.eup %3393 }
 0xf37   :  { %v3396_v51 = vpop.eup %3395  ;;  %v1365_v52 = vmul.f32 %v3394_v41, %v1349_v1 }
 0xf38   :  { %v1364_v55 = vmul.f32 %v3396_v51, %v1348_v23 }
 0xf39   :  { %v1371_v59 = vmul.f32 %v2717_v50, %v1365_v52 }
 0xf3a   :  { %v1370_v61 = vmul.f32 %v2717_v50, %v1364_v55 }
 0xf3b   :  { %v1377_v63 = vadd.f32 %v2718_v56, %v1371_v59 }
 0xf3c   :  { %v1376_v62 = vadd.f32 %v2718_v56, %v1370_v61 }
 0xf3e   :  { %2997 = vmatprep.mubr.msk.f32.mxu1 %vm53_vm0, %v1376_v62 }
 0xf3f   :  { %2998 = vmatmul.mubr.msk.f32.vlgmr.msra.gmra.mrb[12].mxu1 %vm53_vm0, %v1377_v63 }
0x1012   :  { %v2999_v3 = vpop.f32.mrb[12].mxu1 }
0x1013   :  { %v3804_v60 = vadd.f32 %v2999_v3, %v2719_v2  ;;  %v1454_v4 = vpop.f32.mrb[13].mxu1 }
0x1014   :  { %v3806_v5 = vadd.f32 %v2719_v2, %v1454_v4 }
0x1016   :  { %3004 = vmatprep.mubr.msk.f32.mxu1 %vm184_vm1, %v3806_v5  ;;  %v3812_v6 = vpack.i.bf16 %v3804_v60, %v3806_v5 }
0x1018   :  { %3319 = vrot.lane.b32.xlu1 %v3812_v6, %s3463_s10  ;;  %3314 = vrot.lane.b32.xlu0 %v3812_v6, %s3464_s11 }
0x101c   :  { %1661 = vrot.lane.b32.xlu1 %v3806_v5, %s3465_s12 }
0x1020   :  { %1663 = vrot.lane.b32.xlu1 %v3804_v60, %s3465_s12 }
0x108a   :  { %v3320_v7 = vpop.permute.xlu1 %3319  ;;  %v3315_v8 = vpop.permute.xlu0 %3314 }
0x108b   :  { %v3322_v9 = vunpack.i.h.bf16 %v3320_v7  ;;  %v3321_v10 = vunpack.i.l.bf16 %v3320_v7  ;;  %v3317_v11 = vunpack.i.h.bf16 %v3315_v8  ;;  %v3316_v12 = vunpack.i.l.bf16 %v3315_v8 }
0x108d   :  { %v3185_v13 = vpack.c.bf16 %v3317_v11, %v3316_v12  ;;  %v3195_v14 = vpack.c.bf16 %v3322_v9, %v3321_v10 }
0x108e   :  { %v1662_v15 = vpop.permute.xlu1 %1661 }
0x108f   :  { %3187 = vmatprep.subr.msk.bf16.mxu1 %vm3570_vm2, %v3185_v13 }
0x1090   :  { %3190 = vmatpush3.bf16.xpose.msk.msra.mxu1 %vm3570_vm2, %v3185_v13 }
0x1091   :  { %3197 = vmatprep.subr.msk.bf16.mxu1 %vm3570_vm2, %v3195_v14 }
0x1092   :  { %v1664_v40 = vpop.permute.xlu1 %1663 }
0x1097   :  { %3005 = vmatmul.mubr.msk.f32.vlgmr.msra.gmra.mrb[14].mxu1 %vm184_vm1, %v3804_v60 }
0x1098   :  { %3200 = vmatpush3.bf16.xpose.msk.msra.mxu1 %vm3570_vm2, %v3195_v14  ;;  %3018 = vmatprep.mubr.msk.f32.mxu1 %vm184_vm1, %v1662_v15 }
0x109f   :  { %3019 = vmatmul.mubr.msk.f32.vlgmr.msra.gmra.mrb[16].mxu1 %vm184_vm1, %v1664_v40 }
0x116a   :  { %v3006_v16 = vpop.f32.mrb[14].mxu1 }
0x116b   :  { %v1549_v38 = vadd.f32 %v3006_v16, %v3589_v53  ;;  %v1543_v17 = vpop.f32.mrb[15].mxu1 }
0x116c   :  { %v1544_v18 = vadd.f32 %v1543_v17, %v3594_v54 }
0x116d   :  { %v1555_v19 = vsel %vm268_vm3, %v1549_v38, -inf }
0x116e   :  { %1556 = vmax.xlane.f32.xlu1 %v1555_v19  ;;  %v1552_v58 = vsel %vm268_vm3, %v1544_v18, -inf }
0x116f   :  { %1553 = vmax.xlane.f32.xlu0 %v1552_v58 }
0x1172   :  { %v3020_v20 = vpop.f32.mrb[16].mxu1 }
0x1173   :  { %v1743_v21 = vpop.f32.mrb[17].mxu1  ;;  %v1749_v26 = vadd.f32 %v3020_v20, %v3589_v53 }
0x1174   :  { %v1744_v57 = vadd.f32 %v1743_v21, %v3594_v54 }
0x1175   :  { %v1755_v28 = vsel %vm268_vm3, %v1749_v26, -inf }
0x1176   :  { %v1752_v27 = vsel %vm268_vm3, %v1744_v57, -inf }
0x1177   :  { %1753 = vmax.xlane.f32.xlu0 %v1752_v27 }
0x117b   :  { %1756 = vmax.xlane.f32.xlu0 %v1755_v28 }
0x11fb   :  { %v1557_v29 = vpop.xlane.xlu1 %1556 }
0x11fc   :  { %v1559_v30 = vsub.f32 %v1549_v38, %v1557_v29  ;;  %v1554_v31 = vpop.xlane.xlu0 %1553 }
0x11fd   :  { %v1558_v1 = vsub.f32 %v1544_v18, %v1554_v31 }
0x11fe   :  { %v1562_v23 = vmul.f32 1.442695, %v1559_v30 }
0x11ff   :  { %v1560_v32 = vmul.f32 1.442695, %v1558_v1 }
0x1200   :  { %3397 = vpow2.f32 %v1562_v23 }
0x1201   :  { %3399 = vpow2.f32 %v1560_v32 }
0x1204   :  { %v1754_v0 = vpop.xlane.xlu0 %1753 }
0x1205   :  { %v1758_v24 = vsub.f32 %v1744_v57, %v1754_v0 }
0x1207   :  { %v1760_v33 = vmul.f32 1.442695, %v1758_v24 }
0x1208   :  { %v1757_v34 = vpop.xlane.xlu0 %1756 }
0x1209   :  { %3401 = vpow2.f32 %v1760_v33  ;;  %v1759_v35 = vsub.f32 %v1749_v26, %v1757_v34 }
0x120a   :  { %v3398_v36 = vpop.eup %3397 }
0x120b   :  { %v3400_v37 = vpop.eup %3399  ;;  %v1762_v39 = vmul.f32 1.442695, %v1759_v35  ;;  %v1567_v42 = vsel %vm268_vm3, %v3398_v36, 0.0 }
0x120c   :  { %1568 = vadd.xlane.f32.xlu1 %v1567_v42  ;;  %v1564_v43 = vsel %vm268_vm3, %v3400_v37, 0.0 }
0x120d   :  { %3403 = vpow2.f32 %v1762_v39  ;;  %1565 = vadd.xlane.f32.xlu0 %v1564_v43 }
0x1213   :  { %v3402_v44 = vpop.eup %3401 }
0x1214   :  { %v1764_v45 = vsel %vm268_vm3, %v3402_v44, 0.0 }
0x1215   :  { %1765 = vadd.xlane.f32.xlu0 %v1764_v45 }
0x1217   :  { %v3404_v46 = vpop.eup %3403 }
0x1218   :  { %v1767_v47 = vsel %vm268_vm3, %v3404_v46, 0.0 }
0x1219   :  { %1768 = vadd.xlane.f32.xlu1 %v1767_v47 }
0x122a   :  { %3329 = vrot.lane.b32.xlu1 %v3812_v6, %s3466_s17 }
0x122b   :  { %3324 = vrot.lane.b32.xlu0 %v3812_v6, %s3467_s18 }
0x122e   :  { %3334 = vrot.lane.b32.xlu1 %v3812_v6, %s3468_s19 }
0x122f   :  { %1863 = vrot.lane.b32.xlu0 %v3804_v60, %s3469_s20 }
0x1232   :  { %1861 = vrot.lane.b32.xlu1 %v3806_v5, %s3469_s20 }
0x1299   :  { %v1569_v41 = vpop.xlane.xlu1 %1568 }
0x129a   :  { %v1566_v49 = vpop.xlane.xlu0 %1565 }
0x129b   :  { %3405 = vrcp.f32 %v1566_v49 }
0x129c   :  { %3407 = vrcp.f32 %v1569_v41 }
0x12a2   :  { %v1766_v50 = vpop.xlane.xlu0 %1765 }
0x12a3   :  { %3409 = vrcp.f32 %v1766_v50 }
0x12a5   :  { %v3406_v51 = vpop.eup %3405 }
0x12a6   :  { %v1769_v52 = vpop.xlane.xlu1 %1768  ;;  %v3325_v55 = vpop.permute.xlu0 %3324  ;;  %v1572_v56 = vmul.f32 %v3406_v51, %v3400_v37 }
0x12a7   :  { %3411 = vrcp.f32 %v1769_v52  ;;  %v3327_v59 = vunpack.i.h.bf16 %v3325_v55  ;;  %v3326_v61 = vunpack.i.l.bf16 %v3325_v55  ;;  %v3408_v63 = vpop.eup %3407  ;;  %v3437_v55 = vld [vmem:[%s4037_s1 + $0x8] sm:$0xff] }
0x12a8   :  { %3011 = vmatprep.mubr.msk.f32.mxu0 %vm268_vm3, %v1572_v56  ;;  %v1573_v8 = vmul.f32 %v3408_v63, %v3398_v36 }
0x12a9   :  { %v3191_v62 = vpack.c.bf16 %v3327_v59, %v3326_v61  ;;  %v3438_v61 = vld [vmem:[%s4037_s1] sm:$0xff] }
0x12aa   :  { %v3330_v2 = vpop.permute.xlu1 %3329  ;;  %v1864_v38 = vpop.permute.xlu0 %1863 }
0x12ab   :  { %v3332_v3 = vunpack.i.h.bf16 %v3330_v2  ;;  %v3331_v4 = vunpack.i.l.bf16 %v3330_v2  ;;  %3192 = vmatprep.subr.bf16.mxu0 %v3191_v62 }
0x12ac   :  { %3194 = vmatpush3.bf16.msra.mxu0 %v3191_v62 }
0x12ad   :  { %v3410_v7 = vpop.eup %3409  ;;  %v3201_v9 = vpack.c.bf16 %v3332_v3, %v3331_v4 }
0x12ae   :  { %v3335_v10 = vpop.permute.xlu1 %3334  ;;  %v1772_v11 = vmul.f32 %v3410_v7, %v3402_v44 }
0x12af   :  { %v3337_v12 = vunpack.i.h.bf16 %v3335_v10  ;;  %v3336_v13 = vunpack.i.l.bf16 %v3335_v10  ;;  %3012 = vmatmul.mubr.msk.f32.vlgmr.msra.gmra.mrb[12].mxu0 %vm268_vm3, %v1573_v8  ;;  %3202 = vmatprep.subr.bf16.mxu0 %v3201_v9 }
0x12b0   :  { %3204 = vmatpush3.bf16.msra.mxu0 %v3201_v9  ;;  %3025 = vmatprep.mubr.msk.f32.mxu0 %vm268_vm3, %v1772_v11 }
0x12b1   :  { %v3412_v14 = vpop.eup %3411  ;;  %v3205_v15 = vpack.c.bf16 %v3337_v12, %v3336_v13 }
0x12b2   :  { %v1773_v40 = vmul.f32 %v3412_v14, %v3404_v46  ;;  %v1862_v16 = vpop.permute.xlu1 %1861 }
0x12b3   :  { %3207 = vmatprep.subr.msk.bf16.mxu0 %vm3570_vm2, %v3205_v15 }
0x12b4   :  { %3026 = vmatmul.mubr.msk.f32.vlgmr.msra.gmra.mrb[14].mxu0 %vm268_vm3, %v1773_v40 }
0x12b5   :  { %3032 = vmatprep.mubr.msk.f32.mxu0 %vm184_vm1, %v1862_v16 }
0x12b9   :  { %3210 = vmatpush3.bf16.xpose.msk.msra.mxu0 %vm3570_vm2, %v3205_v15 }
0x12c0   :  { %3033 = vmatmul.mubr.msk.f32.vlgmr.msra.gmra.mrb[16].mxu0 %vm184_vm1, %v1864_v38 }
0x1382   :  { %v3866_v17 = vpop.f32.mrb[12].mxu0 }
0x1383   :  { %v3868_v18 = vpop.f32.mrb[13].mxu0 }
0x1387   :  { %v3870_v19 = vpop.f32.mrb[14].mxu0 }
0x1388   :  { %v3872_v58 = vpop.f32.mrb[15].mxu0 }
0x1393   :  { %v3034_v20 = vpop.f32.mrb[16].mxu0 }
0x1394   :  { %v1949_v21 = vadd.f32 %v3034_v20, %v3589_v53  ;;  %v1943_v57 = vpop.f32.mrb[17].mxu0 }
0x1395   :  { %v1944_v26 = vadd.f32 %v1943_v57, %v3594_v54 }
0x1396   :  { %v1955_v27 = vsel %vm268_vm3, %v1949_v21, -inf }
0x1397   :  { %1956 = vmax.xlane.f32.xlu0 %v1955_v27  ;;  %v1952_v28 = vsel %vm268_vm3, %v1944_v26, -inf  ;;  %v2695_v27 = vld [vmem:[%s4038_s2 + $0x98] sm:$0xff] }
0x1398   :  { %1953 = vmax.xlane.f32.xlu1 %v1952_v28 }
0x13a9   :  { %3339 = vrot.lane.b32.xlu1 %v3812_v6, %s3470_s21 }
0x13ad   :  { %2061 = vrot.lane.b32.xlu1 %v3806_v5, %s3471_s0 }
0x13b1   :  { %2063 = vrot.lane.b32.xlu1 %v3804_v60, %s3471_s0 }
0x1424   :  { %v1957_v29 = vpop.xlane.xlu0 %1956 }
0x1425   :  { %v1959_v53 = vsub.f32 %v1949_v21, %v1957_v29  ;;  %v1954_v30 = vpop.xlane.xlu1 %1953  ;;  %v2696_v29 = vld [vmem:[%s4038_s2 + $0xb0] sm:$0xff] }
0x1426   :  { %v1958_v31 = vsub.f32 %v1944_v26, %v1954_v30  ;;  %v2693_v26 = vld [vmem:[%s4038_s2 + $0x68] sm:$0xff] }
0x1427   :  { %v1962_v54 = vmul.f32 1.442695, %v1959_v53  ;;  %v3229_v53 = vpack.c.bf16 %v2696_v29, %v2695_v27 }
0x1428   :  { %v1960_v1 = vmul.f32 1.442695, %v1958_v31 }
0x1429   :  { %3413 = vpow2.f32 %v1962_v54  ;;  %v3340_v23 = vpop.permute.xlu1 %3339 }
0x142a   :  { %v3342_v32 = vunpack.i.h.bf16 %v3340_v23  ;;  %v3341_v0 = vunpack.i.l.bf16 %v3340_v23  ;;  %3415 = vpow2.f32 %v1960_v1 }
0x142c   :  { %v3211_v24 = vpack.c.bf16 %v3342_v32, %v3341_v0 }
0x142d   :  { %v2062_v49 = vpop.permute.xlu1 %2061 }
0x142e   :  { %3212 = vmatprep.subr.bf16.mxu1 %v3211_v24 }
0x142f   :  { %3214 = vmatpush3.bf16.msra.mxu1 %v3211_v24 }
0x1431   :  { %v2064_v41 = vpop.permute.xlu1 %2063 }
0x1433   :  { %v3414_v33 = vpop.eup %3413 }
0x1434   :  { %v1967_v5 = vsel %vm268_vm3, %v3414_v33, 0.0  ;;  %v3416_v34 = vpop.eup %3415 }
0x1435   :  { %1968 = vadd.xlane.f32.xlu0 %v1967_v5  ;;  %v1964_v60 = vsel %vm268_vm3, %v3416_v34, 0.0 }
0x1439   :  { %1965 = vadd.xlane.f32.xlu0 %v1964_v60 }
0x144f   :  { %3344 = vrot.lane.b32.xlu0 %v3812_v6, %s3472_s22 }
0x14c2   :  { %v1969_v35 = vpop.xlane.xlu0 %1968 }
0x14c3   :  { %3417 = vrcp.f32 %v1969_v35 }
0x14c6   :  { %v1966_v36 = vpop.xlane.xlu0 %1965 }
0x14c7   :  { %3419 = vrcp.f32 %v1966_v36 }
0x14ca   :  { %v3345_v37 = vpop.permute.xlu0 %3344 }
0x14cb   :  { %v3347_v39 = vunpack.i.h.bf16 %v3345_v37  ;;  %v3346_v42 = vunpack.i.l.bf16 %v3345_v37 }
0x14cd   :  { %v3215_v43 = vpack.c.bf16 %v3347_v39, %v3346_v42  ;;  %v3418_v44 = vpop.eup %3417 }
0x14ce   :  { %v1973_v47 = vmul.f32 %v3418_v44, %v3414_v33 }
0x14cf   :  { %3217 = vmatprep.subr.msk.bf16.mxu1 %vm3570_vm2, %v3215_v43 }
0x14d1   :  { %v3420_v45 = vpop.eup %3419 }
0x14d2   :  { %v1972_v46 = vmul.f32 %v3420_v45, %v3416_v34 }
0x14d4   :  { %3039 = vmatprep.mubr.msk.f32.mxu1 %vm268_vm3, %v1972_v46 }
0x14d5   :  { %3040 = vmatmul.mubr.msk.f32.vlgmr.msra.gmra.mrb[18].mxu1 %vm268_vm3, %v1973_v47 }
0x14d6   :  { %3220 = vmatpush3.bf16.xpose.msk.msra.mxu1 %vm3570_vm2, %v3215_v43  ;;  %3046 = vmatprep.mubr.msk.f32.mxu1 %vm184_vm1, %v2062_v49 }
0x14dd   :  { %3047 = vmatmul.mubr.msk.f32.vlgmr.msra.gmra.mrb[20].mxu1 %vm184_vm1, %v2064_v41 }
0x15a8   :  { %v3041_v50 = vpop.f32.mrb[18].mxu1 }
0x15a9   :  { %v2052_v51 = vpop.f32.mrb[19].mxu1 }
0x15b0   :  { %v3048_v52 = vpop.f32.mrb[20].mxu1 }
0x15b1   :  { %v2149_v56 = vadd.f32 %v3437_v55, %v3048_v52  ;;  %v2143_v59 = vpop.f32.mrb[21].mxu1 }
0x15b2   :  { %v2144_v48 = vadd.f32 %v3438_v61, %v2143_v59  ;;  %v2697_v59 = vld [vmem:[%s4038_s2 + $0x70] sm:$0xff]  ;;  %v2698_v61 = vld [vmem:[%s4038_s2 + $0x88] sm:$0xff] }
0x15b3   :  { %v2155_v62 = vsel %vm268_vm3, %v2149_v56, -inf }
0x15b4   :  { %2156 = vmax.xlane.f32.xlu0 %v2155_v62  ;;  %v2152_v63 = vsel %vm268_vm3, %v2144_v48, -inf  ;;  %v2699_v62 = vld [vmem:[%s4038_s2 + $0xa0] sm:$0xff] }
0x15b5   :  { %2153 = vmax.xlane.f32.xlu1 %v2152_v63  ;;  %v2700_v63 = vld [vmem:[%s4038_s2 + $0xb8] sm:$0xff] }
0x15c6   :  { %3349 = vrot.lane.b32.xlu1 %v3812_v6, %s3473_s23 }
0x15ca   :  { %2265 = vrot.lane.b32.xlu1 %v3870_v19, %s3474_s24 }
0x15ce   :  { %2271 = vrot.lane.b32.xlu1 %v2052_v51, %s3475_s25 }
0x15d2   :  { %2273 = vrot.lane.b32.xlu1 %v3041_v50, %s3475_s25 }
0x1641   :  { %v2157_v2 = vpop.xlane.xlu0 %2156 }
0x1642   :  { %v2159_v3 = vsub.f32 %v2149_v56, %v2157_v2  ;;  %v2154_v4 = vpop.xlane.xlu1 %2153  ;;  %v3237_v2 = vpack.c.bf16 %v2700_v63, %v2699_v62  ;;  %v2759_v62 = vld [vmem:[%s4040_s4 + $0x10] ss:$0 sm:$0xff] }
0x1643   :  { %v2158_v7 = vsub.f32 %v2144_v48, %v2154_v4  ;;  %v3233_v48 = vpack.c.bf16 %v2698_v61, %v2697_v59  ;;  %v2702_v4 = vld [vmem:[%s4039_s3 + $0x48] sm:$0xff] }
0x1644   :  { %v2162_v8 = vmul.f32 1.442695, %v2159_v3  ;;  %v2701_v3 = vld [vmem:[%s4039_s3 + $0x40] sm:$0xff] }
0x1645   :  { %v2160_v9 = vmul.f32 1.442695, %v2158_v7  ;;  %3234 = vmatprep.subr.bf16.mxu1 %v3233_v48  ;;  %v2703_v7 = vld [vmem:[%s4039_s3 + $0x50] sm:$0xff] }
0x1646   :  { %v3350_v10 = vpop.permute.xlu1 %3349  ;;  %3236 = vmatpush3.bf16.msra.mxu1 %v3233_v48 }
0x1647   :  { %3421 = vpow2.f32 %v2160_v9  ;;  %v3352_v11 = vunpack.i.h.bf16 %v3350_v10  ;;  %v3351_v12 = vunpack.i.l.bf16 %v3350_v10  ;;  %3238 = vmatprep.subr.bf16.mxu1 %v3237_v2  ;;  %v2704_v9 = vld [vmem:[%s4039_s3 + $0x58] sm:$0xff] }
0x1648   :  { %3423 = vpow2.f32 %v2162_v8  ;;  %v3241_v8 = vpack.c.bf16 %v2702_v4, %v2701_v3  ;;  %v3245_v10 = vpack.c.bf16 %v2704_v9, %v2703_v7  ;;  %v2760_v4 = vld [vmem:[%s4040_s4 + $0x11] ss:$0 sm:$0xff] }
0x1649   :  { %v3221_v13 = vpack.c.bf16 %v3352_v11, %v3351_v12  ;;  %v2705_v11 = vld [vmem:[%s4039_s3 + $0x60] sm:$0xff]  ;;  %v2706_v12 = vld [vmem:[%s4039_s3 + $0x68] sm:$0xff] }
0x164a   :  { %v2266_v54 = vpop.permute.xlu1 %2265  ;;  %3240 = vmatpush3.bf16.msra.mxu1 %v3237_v2 }
0x164b   :  { %3222 = vmatprep.subr.bf16.mxu0 %v3221_v13  ;;  %v2286_v33 = vsel %vm184_vm1, %v3866_v17, %v2266_v54 }
0x164c   :  { %3224 = vmatpush3.bf16.msra.mxu0 %v3221_v13  ;;  %v3249_v13 = vpack.c.bf16 %v2706_v12, %v2705_v11 }
0x164e   :  { %v2272_v1 = vpop.permute.xlu1 %2271 }
0x1651   :  { %v3422_v6 = vpop.eup %3421 }
0x1652   :  { %v2164_v14 = vsel %vm268_vm3, %v3422_v6, 0.0  ;;  %v3424_v15 = vpop.eup %3423  ;;  %v2274_v32 = vpop.permute.xlu1 %2273 }
0x1653   :  { %2165 = vadd.xlane.f32.xlu0 %v2164_v14  ;;  %v2167_v40 = vsel %vm268_vm3, %v3424_v15, 0.0  ;;  %v2288_v60 = vsel %vm268_vm3, %v2286_v33, %v2274_v32 }
0x1657   :  { %2168 = vadd.xlane.f32.xlu0 %v2167_v40 }
0x166d   :  { %2263 = vrot.lane.b32.xlu0 %v3872_v58, %s3474_s24  ;;  %v2694_v58 = vld [vmem:[%s4038_s2 + $0x80] sm:$0xff] }
0x166e   :  { %v3225_v28 = vpack.c.bf16 %v2694_v58, %v2693_v26 }
0x1670   :  { %3226 = vmatprep.subr.bf16.mxu0 %v3225_v28 }
0x16e0   :  { %v2166_v16 = vpop.xlane.xlu0 %2165 }
0x16e1   :  { %3425 = vrcp.f32 %v2166_v16 }
0x16e4   :  { %v2169_v38 = vpop.xlane.xlu0 %2168 }
0x16e5   :  { %3427 = vrcp.f32 %v2169_v38 }
0x16e8   :  { %v2264_v23 = vpop.permute.xlu0 %2263 }
0x16e9   :  { %v2285_v0 = vsel %vm184_vm1, %v3868_v18, %v2264_v23  ;;  %v2746_v18 = vld [vmem:[%s4040_s4 + $0x9] ss:$0 sm:$0xff] }
0x16ea   :  { %v2287_v5 = vsel %vm268_vm3, %v2285_v0, %v2272_v1  ;;  %v2751_v1 = vld [vmem:[%s4040_s4 + $0xe] ss:$0 sm:$0xff] }
0x16eb   :  { %v3426_v19 = vpop.eup %3425 }
0x16ec   :  { %v2172_v20 = vmul.f32 %v3426_v19, %v3422_v6 }
0x16ee   :  { %3053 = vmatprep.mubr.msk.f32.mxu0 %vm268_vm3, %v2172_v20  ;;  %v2749_v20 = vld [vmem:[%s4040_s4 + $0xc] ss:$0 sm:$0xff] }
0x16ef   :  { %v3428_v21 = vpop.eup %3427 }
0x16f0   :  { %v2173_v57 = vmul.f32 %v3428_v21, %v3424_v15 }
0x16f2   :  { %3054 = vmatmul.mubr.msk.f32.vlgmr.msra.gmra.mrb[18].mxu0 %vm268_vm3, %v2173_v57  ;;  %v2750_v57 = vld [vmem:[%s4040_s4 + $0xd] ss:$0 sm:$0xff] }
0x16f3   :  { %3228 = vmatpush3.bf16.msra.mxu0 %v3225_v28 }
0x16f4   :  { %3230 = vmatprep.subr.bf16.mxu0 %v3229_v53 }
0x16f7   :  { %3232 = vmatpush3.bf16.msra.mxu0 %v3229_v53 }
0x16f8   :  { %3242 = vmatprep.subr.bf16.mxu0 %v3241_v8 }
0x17c5   :  { %v3055_v30 = vpop.f32.mrb[18].mxu0 }
0x17c6   :  { %2281 = vrot.lane.b32.xlu1 %v3055_v30, %s3476_s9  ;;  %v2252_v31 = vpop.f32.mrb[19].mxu0  ;;  %v2707_v30 = vld [vmem:[%s4039_s3 + $0x70] sm:$0xff] }
0x17c7   :  { %2279 = vrot.lane.b32.xlu0 %v2252_v31, %s3476_s9  ;;  %v2708_v31 = vld [vmem:[%s4039_s3 + $0x78] sm:$0xff] }
0x17c8   :  { %v3253_v54 = vpack.c.bf16 %v2708_v31, %v2707_v30 }
0x1838   :  { %v2282_v24 = vpop.permute.xlu1 %2281 }
0x1839   :  { %v2280_v34 = vpop.permute.xlu0 %2279  ;;  %v2290_v36 = vsel %vm1006_vm4, %v2288_v60, %v2282_v24 }
0x183a   :  { %v2289_v35 = vsel %vm1006_vm4, %v2287_v5, %v2280_v34  ;;  %v2754_v34 = vld [vmem:[%s4040_s4 + $0xf] ss:$0 sm:$0xff] }
0x183b   :  { %3064 = vmatprep.mubr.msk.f32.mxu0 %vm53_vm0, %v2289_v35 }
0x183c   :  { %3065 = vmatmul.mubr.msk.f32.vlgmr.msra.gmra.mrb[20].mxu0 %vm53_vm0, %v2290_v36 }
0x183d   :  { %3244 = vmatpush3.bf16.msra.mxu0 %v3241_v8 }
0x183e   :  { %3246 = vmatprep.subr.bf16.mxu0 %v3245_v10 }
0x1841   :  { %3248 = vmatpush3.bf16.msra.mxu0 %v3245_v10 }
0x1842   :  { %3250 = vmatprep.subr.bf16.mxu0 %v3249_v13 }
0x1845   :  { %3252 = vmatpush3.bf16.msra.mxu0 %v3249_v13 }
0x1846   :  { %3254 = vmatprep.subr.bf16.mxu0 %v3253_v54 }
0x1849   :  { %3256 = vmatpush3.bf16.msra.mxu0 %v3253_v54 }
0x190f   :  { %v3066_v37 = vpop.f32.mrb[20].mxu0 }
0x1910   :  { %v2373_v39 = vadd.f32 %v3066_v37, %v2746_v18  ;;  %v2367_v17 = vpop.f32.mrb[21].mxu0 }
0x1911   :  { %v2368_v42 = vadd.f32 %v2746_v18, %v2367_v17 }
0x1912   :  { %v3944_v43 = vadd.f32 %v2373_v39, %v3768_v22 }
0x1913   :  { %v3947_v44 = vadd.f32 %v2368_v42, %v3771_v25 }
0x1914   :  { %v2381_v45 = vsel %vm53_vm0, %v3944_v43, 0.0 }
0x1915   :  { %2382 = vadd.xlane.f32.xlu1 %v2381_v45  ;;  %v2378_v46 = vsel %vm53_vm0, %v3947_v44, 0.0 }
0x1916   :  { %2379 = vadd.xlane.f32.xlu0 %v2378_v46 }
0x19a2   :  { %v2383_v47 = vpop.xlane.xlu1 %2382 }
0x19a3   :  { %v2385_v49 = vmul.f32 0.03125, %v2383_v47  ;;  %v2380_v41 = vpop.xlane.xlu0 %2379 }
0x19a4   :  { %v2384_v50 = vmul.f32 0.03125, %v2380_v41 }
0x19a5   :  { %v2387_v51 = vsub.f32 %v3944_v43, %v2385_v49 }
0x19a6   :  { %v2386_v22 = vsub.f32 %v3947_v44, %v2384_v50 }
0x19a7   :  { %v2389_v55 = vmul.f32 %v2387_v51, %v2387_v51 }
0x19a8   :  { %v2388_v52 = vmul.f32 %v2386_v22, %v2386_v22 }
0x19a9   :  { %v2393_v56 = vsel %vm53_vm0, %v2389_v55, 0.0 }
0x19aa   :  { %v2390_v25 = vsel %vm53_vm0, %v2388_v52, 0.0 }
0x19ab   :  { %2391 = vadd.xlane.f32.xlu0 %v2390_v25 }
0x19af   :  { %2394 = vadd.xlane.f32.xlu0 %v2393_v56 }
0x1a38   :  { %v2392_v6 = vpop.xlane.xlu0 %2391 }
0x1a39   :  { %v2396_v14 = vmul.f32 0.03125, %v2392_v6 }
0x1a3b   :  { %v2398_v15 = vadd.f32 1e-05, %v2396_v14 }
0x1a3c   :  { %v2395_v40 = vpop.xlane.xlu0 %2394 }
0x1a3d   :  { %3429 = vrsqrt.f32 %v2398_v15  ;;  %v2397_v16 = vmul.f32 0.03125, %v2395_v40 }
0x1a3f   :  { %v2399_v38 = vadd.f32 1e-05, %v2397_v16 }
0x1a41   :  { %3431 = vrsqrt.f32 %v2399_v38 }
0x1a47   :  { %v3430_v19 = vpop.eup %3429 }
0x1a48   :  { %v2402_v21 = vmul.f32 %v3430_v19, %v2386_v22 }
0x1a4a   :  { %v2408_v26 = vmul.f32 %v2749_v20, %v2402_v21 }
0x1a4b   :  { %v3432_v58 = vpop.eup %3431 }
0x1a4c   :  { %v2403_v27 = vmul.f32 %v3432_v58, %v2387_v51  ;;  %v2414_v28 = vadd.f32 %v2750_v57, %v2408_v26 }
0x1a4e   :  { %v2409_v29 = vmul.f32 %v2749_v20, %v2403_v27  ;;  %3075 = vmatprep.mubr.msk.f32.mxu1 %vm53_vm0, %v2414_v28 }
0x1a50   :  { %v2415_v53 = vadd.f32 %v2750_v57, %v2409_v29 }
0x1a52   :  { %3076 = vmatmul.mubr.msk.f32.vlgmr.msra.gmra.mrb[22].mxu1 %vm53_vm0, %v2415_v53 }
0x1b25   :  { %v3077_v23 = vpop.f32.mrb[22].mxu1 }
0x1b26   :  { %v2498_v32 = vadd.f32 %v3077_v23, %v2751_v1  ;;  %v2492_v0 = vpop.f32.mrb[23].mxu1 }
0x1b27   :  { %v2493_v24 = vadd.f32 %v2751_v1, %v2492_v0 }
0x1b28   :  { %v2502_v5 = vmax.f32 %v2498_v32, 0.0 }
0x1b29   :  { %v2501_v33 = vmax.f32 %v2493_v24, 0.0 }
0x1b2b   :  { %3094 = vmatprep.mubr.msk.f32.mxu0 %vm1225_vm5, %v2501_v33 }
0x1b2c   :  { %3095 = vmatmul.mubr.msk.f32.vlgmr.msra.gmra.mrb[22].mxu0 %vm1225_vm5, %v2502_v5 }
0x1bff   :  { %v3096_v60 = vpop.f32.mrb[22].mxu0 }
0x1c00   :  { %v2585_v35 = vadd.f32 %v3096_v60, %v2754_v34  ;;  %v2579_v36 = vpop.f32.mrb[23].mxu0 }
0x1c01   :  { %v2580_v18 = vadd.f32 %v2754_v34, %v2579_v36 }
0x1c02   :  { %v2589_v37 = vadd.f32 %v2585_v35, %v3944_v43 }
0x1c03   :  { %v2588_v39 = vadd.f32 %v2580_v18, %v3947_v44 }
0x1c04   :  { %v2596_v17 = vsel %vm53_vm0, %v2589_v37, 0.0 }
0x1c05   :  { %2597 = vadd.xlane.f32.xlu1 %v2596_v17  ;;  %v2593_v42 = vsel %vm53_vm0, %v2588_v39, 0.0 }
0x1c06   :  { %2594 = vadd.xlane.f32.xlu0 %v2593_v42 }
0x1c92   :  { %v2598_v45 = vpop.xlane.xlu1 %2597 }
0x1c93   :  { %v2600_v46 = vmul.f32 0.03125, %v2598_v45  ;;  %v2595_v47 = vpop.xlane.xlu0 %2594 }
0x1c94   :  { %v2599_v49 = vmul.f32 0.03125, %v2595_v47 }
0x1c95   :  { %v2602_v41 = vsub.f32 %v2589_v37, %v2600_v46 }
0x1c96   :  { %v2601_v50 = vsub.f32 %v2588_v39, %v2599_v49 }
0x1c97   :  { %v2604_v51 = vmul.f32 %v2602_v41, %v2602_v41 }
0x1c98   :  { %v2603_v22 = vmul.f32 %v2601_v50, %v2601_v50 }
0x1c99   :  { %v2608_v52 = vsel %vm53_vm0, %v2604_v51, 0.0 }
0x1c9a   :  { %2609 = vadd.xlane.f32.xlu1 %v2608_v52  ;;  %v2605_v43 = vsel %vm53_vm0, %v2603_v22, 0.0 }
0x1c9b   :  { %2606 = vadd.xlane.f32.xlu0 %v2605_v43 }
0x1d27   :  { %v2610_v44 = vpop.xlane.xlu1 %2609 }
0x1d28   :  { %v2612_v25 = vmul.f32 0.03125, %v2610_v44  ;;  %v2607_v55 = vpop.xlane.xlu0 %2606 }
0x1d29   :  { %v2611_v56 = vmul.f32 0.03125, %v2607_v55 }
0x1d2a   :  { %v2614_v59 = vadd.f32 1e-05, %v2612_v25 }
0x1d2b   :  { %v2613_v61 = vadd.f32 1e-05, %v2611_v56 }
0x1d2c   :  { %3433 = vrsqrt.f32 %v2614_v59 }
0x1d2d   :  { %3435 = vrsqrt.f32 %v2613_v61 }
0x1d36   :  { %v3434_v48 = vpop.eup %3433 }
0x1d37   :  { %v3436_v63 = vpop.eup %3435  ;;  %v2618_v2 = vmul.f32 %v3434_v48, %v2602_v41 }
0x1d38   :  { %v2617_v3 = vmul.f32 %v3436_v63, %v2601_v50 }
0x1d39   :  { %v2624_v7 = vmul.f32 %v2759_v62, %v2618_v2 }
0x1d3a   :  { %v2623_v8 = vmul.f32 %v2759_v62, %v2617_v3 }
0x1d3b   :  { %v2630_v9 = vadd.f32 %v2760_v4, %v2624_v7 }
0x1d3c   :  { %v2629_v10 = vadd.f32 %v2760_v4, %v2623_v8 }
0x1d3d   :  { %2632 = vst.msk [vmem:[#allocation2 + $0x8] sm:$0xff] %vm53_vm0, %v2630_v9 }
0x1d3e   :  { %2631 = vst.msk [vmem:[#allocation2] sm:$0xff] %vm53_vm0, %v2629_v10 }
0x1d3f   :  { %3450 = shalt.err (!%p3447_p4)
}
0x1d40   :  { %s3451_s10 = scalar_lea.hbm %s4041_s5, 256 }
0x1d41   :  { %p3452_p5 = scmp.ne.s32.totalorder %s4041_s5, %s3451_s10  ;;  %p3455_p6 = scmp.lt.u32.totalorder %s3451_s10, %s4041_s5 }
0x1d43   :  { %p3457_p7 = pnand %p3455_p6, %p3452_p5 }
0x1d45   :  { %3460 = shalt.err (!%p3457_p7)
}
0x1d46   :  { %s3478_s1 = smov 128  }
0x1d47   :  { %2644 = dma.vmem_to_hbm [thread:$0]  %s2639_s6, 256, %s4041_s5, [#allocation3], %s3478_s1, %s3478_s1, %s3474_s24  }
0x1d48   :  { %3461 = dma.done.wait [#allocation3], 256  }
0x1d49   :  { %3462 = vsyncadd [#allocation3], 4294967040 }
0x1d4a   :  { %2648 = vsyncpa [#allocation3], 1 }

</bundles_post_ra>
